<compile_context>
chip_gen: v7x
topology: tpu7x:2x2x1
jax: 0.10.0
libtpu: 0.0.40
codegen_flags: <defaults>
</compile_context>

<pallas_src>
import jax
import jax.numpy as jnp
import numpy as np
from jax.experimental import pallas as pl
from jax.experimental.pallas import tpu as pltpu

B = 2        # batch
C_IN = 4     # input_embedding_size
C_PAD = 8    # layer-1 input channels zero-padded to a sublane multiple
L_IN = 64    # sequence length
K = 4        # conv kernel size
EPS = 1e-5   # BatchNorm1d eps


def _lengths(l):
    l1 = l - (K - 1)           # Conv1d(k=4)
    p1 = (l1 - 2) // 2 + 1     # AvgPool1d(2, 2)
    l2 = p1 - (K - 1)
    p2 = (l2 - 2) // 2 + 1
    l3 = p2 - (K - 1)
    return l1, p1, l2, p2, l3


L1, P1, L2, P2, L3 = _lengths(L_IN)          # 61, 30, 27, 13, 10
W1 = B * L_IN - (K - 1)                      # 125  stage-1 conv width (batch-concat lanes)
W2 = B * P1 - (K - 1)                        # 57
W3 = B * P2 - (K - 1)                        # 23
N1, N2, N3 = B * L1, B * L2, B * L3          # BN element counts: 122, 54, 20

# ----------------------- packed constant slab layouts -----------------------
# wslab (144, 128):
#   rows   0: 64, cols  0:32   w1 im2col   (contracting K*C_PAD = 32)
#   rows   0: 64, cols 32:38   BN columns: g1, be1, g2, be2, g3, be3 (zero-padded)
#   rows  64: 96, cols  0:128  w2 im2col, k = 0..1 half
#   rows  96:128, cols  0:128  w2 im2col, k = 2..3 half
#   rows 128:144, cols  0:128  w3 im2col
#
# aux (216, 64)  (all 0/1 or 0.5 constants; one DMA):
#   band 1 rows [  0,125): pool1 [:,0:60]   mask1 [:,60:61]
#   band 2 rows [128,185): pool2 [:,0:26]   mask2 [:,26:27]
#   band 3 rows [192,215): mask3 [:,0:1]  sel [:,1:3]  comp [:,3:23]
#          rows [192,194): expand [:,23:43]
AUX_R2 = 128
AUX_R3 = 192
AUX_ROWS = 216
AUX_COLS = 64


def _build_aux():
    aux = np.zeros((AUX_ROWS, AUX_COLS), np.float32)
    # stage 1: AvgPool1d(2,2) as a block-diagonal matrix (also drops the K-1
    # seam-garbage lanes and the odd tail lane) + valid-lane mask column for BN.
    for b in range(B):
        for p in range(P1):
            aux[b * L_IN + 2 * p,     b * P1 + p] = 0.5
            aux[b * L_IN + 2 * p + 1, b * P1 + p] = 0.5
        aux[b * L_IN:b * L_IN + L1, B * P1] = 1.0
    # stage 2
    for b in range(B):
        for p in range(P2):
            aux[AUX_R2 + b * P1 + 2 * p,     b * P2 + p] = 0.5
            aux[AUX_R2 + b * P1 + 2 * p + 1, b * P2 + p] = 0.5
        aux[AUX_R2 + b * P1:AUX_R2 + b * P1 + L2, B * P2] = 1.0
    # stage 3: BN mask | per-batch valid indicator | seam-compaction | lane expander
    for b in range(B):
        aux[AUX_R3 + b * P2:AUX_R3 + b * P2 + L3, 0] = 1.0          # mask3
        aux[AUX_R3 + b * P2:AUX_R3 + b * P2 + L3, 1 + b] = 1.0      # sel (W3, B)
        for l in range(L3):
            aux[AUX_R3 + b * P2 + l, 3 + b * L3 + l] = 1.0          # comp (W3, B*L3)
        aux[AUX_R3 + b, 23 + b * L3:23 + (b + 1) * L3] = 1.0        # expand (B, B*L3)
    return aux


_AUX = jnp.asarray(_build_aux())


# ------------------------------ kernel helpers ------------------------------
def _bn_prelu(y, gamma, beta, mask_col, alpha, n):
    """Training-mode BatchNorm1d (batch stats, biased var) + PReLU.

    y: (C, W) with valid lanes marked by the 0/1 column mask_col (W, 1).
    Stats (sum and sum-of-squares) computed by a single MXU matmul of
    concat([y, y*y]) against mask_col; normalization scale uses EUP rsqrt.
    Seam-garbage lanes stay in y (finite) and are dropped downstream.
    """
    c = y.shape[0]
    yy = jnp.concatenate([y, y * y], axis=0)                              # (2C, W)
    stats = jnp.dot(yy, mask_col, preferred_element_type=jnp.float32)     # (2C, 1)
    inv_n = 1.0 / n
    mean = stats[0:c] * inv_n
    var = stats[c:2 * c] * inv_n - mean * mean
    scale = gamma * jax.lax.rsqrt(var + EPS)
    z = (y - mean) * scale + beta
    return jnp.where(z > 0, z, alpha * z)


# ---------------------------------- kernel ----------------------------------
def embedding_net_l2_kernel(x_ref, w_ref, aux_ref, alpha_ref, out_ref):
    # ---------- stage 1: Conv1d(4->64, k=4) + BN + PReLU + AvgPool1d(2,2) ----------
    xt = x_ref[...]                                                        # (8, 128)
    col1 = jnp.concatenate([xt[:, k:k + W1] for k in range(K)], axis=0)   # (32, 125)
    y = jnp.dot(w_ref[0:64, 0:32], col1,
                preferred_element_type=jnp.float32)                       # (64, 125)
    y = _bn_prelu(y, w_ref[0:64, 32:33], w_ref[0:64, 33:34],
                  aux_ref[0:W1, 60:61], alpha_ref[0], float(N1))
    y = jnp.dot(y, aux_ref[0:W1, 0:B * P1],
                preferred_element_type=jnp.float32)                       # (64, 60)

    # ---------- stage 2: Conv1d(64->32, k=4) + BN + PReLU + AvgPool1d(2,2) ----------
    # contracting dim split 256 -> 2 x 128: lower vreg pressure, v5e-native passes.
    col_a = jnp.concatenate([y[:, 0:W2], y[:, 1:1 + W2]], axis=0)         # (128, 57)
    col_b = jnp.concatenate([y[:, 2:2 + W2], y[:, 3:3 + W2]], axis=0)     # (128, 57)
    y = (jnp.dot(w_ref[64:96, :], col_a, preferred_element_type=jnp.float32) +
         jnp.dot(w_ref[96:128, :], col_b, preferred_element_type=jnp.float32))  # (32, 57)
    y = _bn_prelu(y, w_ref[0:32, 34:35], w_ref[0:32, 35:36],
                  aux_ref[AUX_R2:AUX_R2 + W2, 26:27], alpha_ref[1], float(N2))
    y = jnp.dot(y, aux_ref[AUX_R2:AUX_R2 + W2, 0:B * P2],
                preferred_element_type=jnp.float32)                       # (32, 26)

    # ---------- stage 3: Conv1d(32->16, k=4) + BN + PReLU ----------
    col3 = jnp.concatenate([y[:, k:k + W3] for k in range(K)], axis=0)    # (128, 23)
    y = jnp.dot(w_ref[128:144, :], col3,
                preferred_element_type=jnp.float32)                       # (16, 23)
    y = _bn_prelu(y, w_ref[0:16, 36:37], w_ref[0:16, 37:38],
                  aux_ref[AUX_R3:AUX_R3 + W3, 0:1], alpha_ref[2], float(N3))

    # ---------- per-batch L2 normalize + seam compaction, one lane-dense store ----------
    t = jnp.dot(y * y, aux_ref[AUX_R3:AUX_R3 + W3, 1:3],
                preferred_element_type=jnp.float32)                       # (16, B)
    inv = jax.lax.rsqrt(jnp.sum(t, axis=0, keepdims=True))                # (1, B)
    inv_lanes = jnp.dot(inv, aux_ref[AUX_R3:AUX_R3 + B, 23:23 + B * L3],
                        preferred_element_type=jnp.float32)               # (1, B*L3)
    yc = jnp.dot(y, aux_ref[AUX_R3:AUX_R3 + W3, 3:3 + B * L3],
                 preferred_element_type=jnp.float32)                      # (16, B*L3)
    out_ref[...] = yc * inv_lanes


# --------------------------------- wrapper ----------------------------------
def _im2col_weight(w, cin_pad=None):
    """PyTorch Conv1d weight (Cout, Cin, K) -> (Cout, K*Cin[_pad]) im2col weight
    with column order k*Cin + ci."""
    cout, cin, _ = w.shape
    if cin_pad is not None and cin_pad > cin:
        w = jnp.pad(w, ((0, 0), (0, cin_pad - cin), (0, 0)))
    return jnp.transpose(w, (0, 2, 1)).reshape(cout, -1)


@jax.jit
def embedding_net_l2(x, params):
    (w1, b1, g1, be1, a1,
     w2, b2, g2, be2, a2,
     w3, b3, g3, be3, a3) = params
    # Conv biases are cancelled exactly by training-mode BatchNorm (mean shift
    # and variance are bias-invariant) -> dropped from the kernel entirely.
    del b1, b2, b3

    # Lane-dense input: (C_PAD, B*L_IN), batch blocks concatenated along lanes,
    # channels zero-padded 4 -> 8 so in-kernel im2col concatenation is tile-aligned.
    xt = jnp.transpose(x, (1, 0, 2)).reshape(C_IN, B * L_IN)
    xt = jnp.pad(xt, ((0, C_PAD - C_IN), (0, 0)))

    # One packed weight slab (conv weights + BN gamma/beta) -> one input DMA.
    w1d = _im2col_weight(w1, C_PAD)                         # (64, 32)
    w2d = _im2col_weight(w2)                                # (32, 256)
    w3d = _im2col_weight(w3)                                # (16, 128)
    col64 = lambda v: jnp.pad(v, (0, 64 - v.shape[0])).reshape(64, 1)
    bn_cols = jnp.concatenate(
        [col64(g1), col64(be1), col64(g2), col64(be2), col64(g3), col64(be3)],
        axis=1)                                             # (64, 6)
    band1 = jnp.concatenate(
        [w1d, bn_cols, jnp.zeros((64, 128 - 32 - 6), jnp.float32)], axis=1)
    wslab = jnp.concatenate(
        [band1, w2d[:, 0:128], w2d[:, 128:256], w3d], axis=0)   # (144, 128)

    alphas = jnp.stack([a1, a2, a3]).astype(jnp.float32)    # (3,) PReLU slopes -> SMEM

    vmem = pl.BlockSpec(memory_space=pltpu.MemorySpace.VMEM)
    smem = pl.BlockSpec(memory_space=pltpu.MemorySpace.SMEM)

    out = pl.pallas_call(
        embedding_net_l2_kernel,
        out_shape=jax.ShapeDtypeStruct((16, B * L3), jnp.float32),
        in_specs=[vmem, vmem, vmem, smem],
        out_specs=vmem,
        cost_estimate=pl.CostEstimate(
            flops=2_650_000, transcendentals=128, bytes_accessed=135_000),
    )(xt, wslab, _AUX, alphas)

    # (16, B*L3) lane-dense kernel output -> (B, 16*L3), matching output.view(B, -1)
    return out.reshape(16, B, L3).transpose(1, 0, 2).reshape(B, 16 * L3)


# -------------------------- deterministic parameters -------------------------
def make_params(key):
    k1, k2, k3 = jax.random.split(key, 3)

    def conv_p(k, cout, cin, ksize=K):
        kw, kb = jax.random.split(k)
        w = jax.random.normal(kw, (cout, cin, ksize), jnp.float32) * 0.1
        b = jax.random.normal(kb, (cout,), jnp.float32) * 0.1
        return w, b

    w1, b1 = conv_p(k1, 64, C_IN)
    w2, b2 = conv_p(k2, 32, 64)
    w3, b3 = conv_p(k3, 16, 32)

    def bn_p(c):                                            # PyTorch defaults
        return jnp.ones((c,), jnp.float32), jnp.zeros((c,), jnp.float32)

    g1, be1 = bn_p(64)
    g2, be2 = bn_p(32)
    g3, be3 = bn_p(16)
    a = jnp.array(0.25, jnp.float32)                        # nn.PReLU() default

    return (w1, b1, g1, be1, a,
            w2, b2, g2, be2, a,
            w3, b3, g3, be3, a)


# ------------------------------ pure-JAX reference ---------------------------
def reference(x, params):
    (w1, b1, g1, be1, a1,
     w2, b2, g2, be2, a2,
     w3, b3, g3, be3, a3) = params

    def conv(x, w, b):
        lout = x.shape[2] - w.shape[2] + 1
        acc = jnp.zeros((x.shape[0], w.shape[0], lout), jnp.float32)
        for k in range(w.shape[2]):
            acc = acc + jnp.einsum('oc,bcl->bol', w[:, :, k], x[:, :, k:k + lout])
        return acc + b[None, :, None]

    def bn_prelu(y, g, be, a):
        mean = y.mean(axis=(0, 2), keepdims=True)
        var = ((y - mean) ** 2).mean(axis=(0, 2), keepdims=True)
        z = (y - mean) / jnp.sqrt(var + EPS) * g[None, :, None] + be[None, :, None]
        return jnp.where(z > 0, z, a * z)

    def pool(y):
        p = (y.shape[2] - 2) // 2 + 1
        return y[:, :, :2 * p].reshape(y.shape[0], y.shape[1], p, 2).mean(-1)

    y = pool(bn_prelu(conv(x, w1, b1), g1, be1, a1))
    y = pool(bn_prelu(conv(y, w2, b2), g2, be2, a2))
    y = bn_prelu(conv(y, w3, b3), g3, be3, a3)
    y = y.reshape(y.shape[0], -1)
    return y / jnp.sqrt((y ** 2).sum(axis=1, keepdims=True))


if __name__ == "__main__":
    key = jax.random.PRNGKey(0)
    kx, kp = jax.random.split(key)
    x = jax.random.normal(kx, (B, C_IN, L_IN), jnp.float32)
    params = make_params(kp)

    out = jax.block_until_ready(embedding_net_l2(x, params))
    assert out.shape == (B, 16 * L3)

    ref = reference(x, params)
    np.testing.assert_allclose(np.asarray(out), np.asarray(ref),
                               rtol=2e-3, atol=2e-3)
    print("KERNEL_OK")
</pallas_src>

<mosaic_0001>
module attributes {stable_mosaic.version = 11 : i64} {
  func.func @embedding_net_l2_kernel(%arg0: memref<8x128xf32, #tpu.memory_space<vmem>>, %arg1: memref<144x128xf32, #tpu.memory_space<vmem>>, %arg2: memref<216x64xf32, #tpu.memory_space<vmem>>, %arg3: memref<3xf32, #tpu.memory_space<smem>>, %arg4: memref<16x20xf32, #tpu.memory_space<vmem>>) attributes {dimension_semantics = [], scalar_prefetch = 0 : i64, scratch_operands = 0 : i64, tpu.core_type = #tpu.core_type<tc>} {
    %c0 = arith.constant 0 : index
    %c0_0 = arith.constant 0 : index
    %0 = vector.load %arg0[%c0, %c0_0] : memref<8x128xf32, #tpu.memory_space<vmem>>, vector<8x128xf32>
    %1 = vector.extract_strided_slice %0 {offsets = [0, 0], sizes = [8, 125], strides = [1, 1]} : vector<8x128xf32> to vector<8x125xf32>
    %2 = vector.extract_strided_slice %0 {offsets = [0, 1], sizes = [8, 125], strides = [1, 1]} : vector<8x128xf32> to vector<8x125xf32>
    %3 = vector.extract_strided_slice %0 {offsets = [0, 2], sizes = [8, 125], strides = [1, 1]} : vector<8x128xf32> to vector<8x125xf32>
    %4 = vector.extract_strided_slice %0 {offsets = [0, 3], sizes = [8, 125], strides = [1, 1]} : vector<8x128xf32> to vector<8x125xf32>
    %5 = tpu.concatenate %1, %2, %3, %4 in 0 : vector<8x125xf32>, vector<8x125xf32>, vector<8x125xf32>, vector<8x125xf32> -> vector<32x125xf32>
    %c0_1 = arith.constant 0 : index
    %c0_2 = arith.constant 0 : index
    %6 = vector.load %arg1[%c0_1, %c0_2] : memref<144x128xf32, #tpu.memory_space<vmem>>, vector<64x32xf32>
    %cst = arith.constant dense<0.000000e+00> : vector<64x125xf32>
    %7 = tpu.matmul %6, %5, %cst {dimension_numbers = #tpu.dot_dimension_numbers<[1], [0], [0], [1], [0, 0, 1, 1], [], []>} : vector<64x32xf32>, vector<32x125xf32>, vector<64x125xf32> -> vector<64x125xf32>
    %c0_3 = arith.constant 0 : index
    %c32 = arith.constant 32 : index
    %8 = vector.load %arg1[%c0_3, %c32] : memref<144x128xf32, #tpu.memory_space<vmem>>, vector<64x1xf32>
    %c0_4 = arith.constant 0 : index
    %c33 = arith.constant 33 : index
    %9 = vector.load %arg1[%c0_4, %c33] : memref<144x128xf32, #tpu.memory_space<vmem>>, vector<64x1xf32>
    %c0_5 = arith.constant 0 : index
    %c60 = arith.constant 60 : index
    %10 = vector.load %arg2[%c0_5, %c60] : memref<216x64xf32, #tpu.memory_space<vmem>>, vector<125x1xf32>
    %c0_6 = arith.constant 0 : index
    %11 = memref.load %arg3[%c0_6] : memref<3xf32, #tpu.memory_space<smem>>
    %12 = arith.mulf %7, %7 : vector<64x125xf32>
    %13 = tpu.concatenate %7, %12 in 0 : vector<64x125xf32>, vector<64x125xf32> -> vector<128x125xf32>
    %cst_7 = arith.constant dense<0.000000e+00> : vector<128x1xf32>
    %14 = tpu.matmul %13, %10, %cst_7 {dimension_numbers = #tpu.dot_dimension_numbers<[1], [0], [0], [1], [0, 0, 1, 1], [], []>} : vector<128x125xf32>, vector<125x1xf32>, vector<128x1xf32> -> vector<128x1xf32>
    %15 = vector.extract_strided_slice %14 {offsets = [0, 0], sizes = [64, 1], strides = [1, 1]} : vector<128x1xf32> to vector<64x1xf32>
    %cst_8 = arith.constant 0.00819672085 : f32
    %16 = vector.broadcast %cst_8 : f32 to vector<64x1xf32>
    %17 = arith.mulf %15, %16 : vector<64x1xf32>
    %18 = vector.extract_strided_slice %14 {offsets = [64, 0], sizes = [64, 1], strides = [1, 1]} : vector<128x1xf32> to vector<64x1xf32>
    %cst_9 = arith.constant 0.00819672085 : f32
    %19 = vector.broadcast %cst_9 : f32 to vector<64x1xf32>
    %20 = arith.mulf %18, %19 : vector<64x1xf32>
    %21 = arith.mulf %17, %17 : vector<64x1xf32>
    %22 = arith.subf %20, %21 : vector<64x1xf32>
    %cst_10 = arith.constant 9.99999974E-6 : f32
    %23 = vector.broadcast %cst_10 : f32 to vector<64x1xf32>
    %24 = arith.addf %22, %23 : vector<64x1xf32>
    %25 = math.rsqrt %24 : vector<64x1xf32>
    %26 = arith.mulf %8, %25 : vector<64x1xf32>
    %27 = vector.broadcast %17 : vector<64x1xf32> to vector<64x125xf32>
    %28 = arith.subf %7, %27 : vector<64x125xf32>
    %29 = vector.broadcast %26 : vector<64x1xf32> to vector<64x125xf32>
    %30 = arith.mulf %28, %29 : vector<64x125xf32>
    %31 = vector.broadcast %9 : vector<64x1xf32> to vector<64x125xf32>
    %32 = arith.addf %30, %31 : vector<64x125xf32>
    %cst_11 = arith.constant 0.000000e+00 : f32
    %33 = vector.broadcast %cst_11 : f32 to vector<64x125xf32>
    %34 = arith.cmpf ogt, %32, %33 : vector<64x125xf32>
    %35 = vector.broadcast %11 : f32 to vector<64x125xf32>
    %36 = arith.mulf %35, %32 : vector<64x125xf32>
    %37 = arith.select %34, %32, %36 : vector<64x125xi1>, vector<64x125xf32>
    %c0_12 = arith.constant 0 : index
    %c0_13 = arith.constant 0 : index
    %38 = vector.load %arg2[%c0_12, %c0_13] : memref<216x64xf32, #tpu.memory_space<vmem>>, vector<125x60xf32>
    %cst_14 = arith.constant dense<0.000000e+00> : vector<64x60xf32>
    %39 = tpu.matmul %37, %38, %cst_14 {dimension_numbers = #tpu.dot_dimension_numbers<[1], [0], [0], [1], [0, 0, 1, 1], [], []>} : vector<64x125xf32>, vector<125x60xf32>, vector<64x60xf32> -> vector<64x60xf32>
    %40 = vector.extract_strided_slice %39 {offsets = [0, 0], sizes = [64, 57], strides = [1, 1]} : vector<64x60xf32> to vector<64x57xf32>
    %41 = vector.extract_strided_slice %39 {offsets = [0, 1], sizes = [64, 57], strides = [1, 1]} : vector<64x60xf32> to vector<64x57xf32>
    %42 = tpu.concatenate %40, %41 in 0 : vector<64x57xf32>, vector<64x57xf32> -> vector<128x57xf32>
    %43 = vector.extract_strided_slice %39 {offsets = [0, 2], sizes = [64, 57], strides = [1, 1]} : vector<64x60xf32> to vector<64x57xf32>
    %44 = vector.extract_strided_slice %39 {offsets = [0, 3], sizes = [64, 57], strides = [1, 1]} : vector<64x60xf32> to vector<64x57xf32>
    %45 = tpu.concatenate %43, %44 in 0 : vector<64x57xf32>, vector<64x57xf32> -> vector<128x57xf32>
    %c64 = arith.constant 64 : index
    %c0_15 = arith.constant 0 : index
    %46 = vector.load %arg1[%c64, %c0_15] : memref<144x128xf32, #tpu.memory_space<vmem>>, vector<32x128xf32>
    %cst_16 = arith.constant dense<0.000000e+00> : vector<32x57xf32>
    %47 = tpu.matmul %46, %42, %cst_16 {dimension_numbers = #tpu.dot_dimension_numbers<[1], [0], [0], [1], [0, 0, 1, 1], [], []>} : vector<32x128xf32>, vector<128x57xf32>, vector<32x57xf32> -> vector<32x57xf32>
    %c96 = arith.constant 96 : index
    %c0_17 = arith.constant 0 : index
    %48 = vector.load %arg1[%c96, %c0_17] : memref<144x128xf32, #tpu.memory_space<vmem>>, vector<32x128xf32>
    %cst_18 = arith.constant dense<0.000000e+00> : vector<32x57xf32>
    %49 = tpu.matmul %48, %45, %cst_18 {dimension_numbers = #tpu.dot_dimension_numbers<[1], [0], [0], [1], [0, 0, 1, 1], [], []>} : vector<32x128xf32>, vector<128x57xf32>, vector<32x57xf32> -> vector<32x57xf32>
    %50 = arith.addf %47, %49 : vector<32x57xf32>
    %c0_19 = arith.constant 0 : index
    %c34 = arith.constant 34 : index
    %51 = vector.load %arg1[%c0_19, %c34] : memref<144x128xf32, #tpu.memory_space<vmem>>, vector<32x1xf32>
    %c0_20 = arith.constant 0 : index
    %c35 = arith.constant 35 : index
    %52 = vector.load %arg1[%c0_20, %c35] : memref<144x128xf32, #tpu.memory_space<vmem>>, vector<32x1xf32>
    %c128 = arith.constant 128 : index
    %c26 = arith.constant 26 : index
    %53 = vector.load %arg2[%c128, %c26] : memref<216x64xf32, #tpu.memory_space<vmem>>, vector<57x1xf32>
    %c1 = arith.constant 1 : index
    %54 = memref.load %arg3[%c1] : memref<3xf32, #tpu.memory_space<smem>>
    %55 = arith.mulf %50, %50 : vector<32x57xf32>
    %56 = tpu.concatenate %50, %55 in 0 : vector<32x57xf32>, vector<32x57xf32> -> vector<64x57xf32>
    %cst_21 = arith.constant dense<0.000000e+00> : vector<64x1xf32>
    %57 = tpu.matmul %56, %53, %cst_21 {dimension_numbers = #tpu.dot_dimension_numbers<[1], [0], [0], [1], [0, 0, 1, 1], [], []>} : vector<64x57xf32>, vector<57x1xf32>, vector<64x1xf32> -> vector<64x1xf32>
    %58 = vector.extract_strided_slice %57 {offsets = [0, 0], sizes = [32, 1], strides = [1, 1]} : vector<64x1xf32> to vector<32x1xf32>
    %cst_22 = arith.constant 0.0185185187 : f32
    %59 = vector.broadcast %cst_22 : f32 to vector<32x1xf32>
    %60 = arith.mulf %58, %59 : vector<32x1xf32>
    %61 = vector.extract_strided_slice %57 {offsets = [32, 0], sizes = [32, 1], strides = [1, 1]} : vector<64x1xf32> to vector<32x1xf32>
    %cst_23 = arith.constant 0.0185185187 : f32
    %62 = vector.broadcast %cst_23 : f32 to vector<32x1xf32>
    %63 = arith.mulf %61, %62 : vector<32x1xf32>
    %64 = arith.mulf %60, %60 : vector<32x1xf32>
    %65 = arith.subf %63, %64 : vector<32x1xf32>
    %cst_24 = arith.constant 9.99999974E-6 : f32
    %66 = vector.broadcast %cst_24 : f32 to vector<32x1xf32>
    %67 = arith.addf %65, %66 : vector<32x1xf32>
    %68 = math.rsqrt %67 : vector<32x1xf32>
    %69 = arith.mulf %51, %68 : vector<32x1xf32>
    %70 = vector.broadcast %60 : vector<32x1xf32> to vector<32x57xf32>
    %71 = arith.subf %50, %70 : vector<32x57xf32>
    %72 = vector.broadcast %69 : vector<32x1xf32> to vector<32x57xf32>
    %73 = arith.mulf %71, %72 : vector<32x57xf32>
    %74 = vector.broadcast %52 : vector<32x1xf32> to vector<32x57xf32>
    %75 = arith.addf %73, %74 : vector<32x57xf32>
    %cst_25 = arith.constant 0.000000e+00 : f32
    %76 = vector.broadcast %cst_25 : f32 to vector<32x57xf32>
    %77 = arith.cmpf ogt, %75, %76 : vector<32x57xf32>
    %78 = vector.broadcast %54 : f32 to vector<32x57xf32>
    %79 = arith.mulf %78, %75 : vector<32x57xf32>
    %80 = arith.select %77, %75, %79 : vector<32x57xi1>, vector<32x57xf32>
    %c128_26 = arith.constant 128 : index
    %c0_27 = arith.constant 0 : index
    %81 = vector.load %arg2[%c128_26, %c0_27] : memref<216x64xf32, #tpu.memory_space<vmem>>, vector<57x26xf32>
    %cst_28 = arith.constant dense<0.000000e+00> : vector<32x26xf32>
    %82 = tpu.matmul %80, %81, %cst_28 {dimension_numbers = #tpu.dot_dimension_numbers<[1], [0], [0], [1], [0, 0, 1, 1], [], []>} : vector<32x57xf32>, vector<57x26xf32>, vector<32x26xf32> -> vector<32x26xf32>
    %83 = vector.extract_strided_slice %82 {offsets = [0, 0], sizes = [32, 23], strides = [1, 1]} : vector<32x26xf32> to vector<32x23xf32>
    %84 = vector.extract_strided_slice %82 {offsets = [0, 1], sizes = [32, 23], strides = [1, 1]} : vector<32x26xf32> to vector<32x23xf32>
    %85 = vector.extract_strided_slice %82 {offsets = [0, 2], sizes = [32, 23], strides = [1, 1]} : vector<32x26xf32> to vector<32x23xf32>
    %86 = vector.extract_strided_slice %82 {offsets = [0, 3], sizes = [32, 23], strides = [1, 1]} : vector<32x26xf32> to vector<32x23xf32>
    %87 = tpu.concatenate %83, %84, %85, %86 in 0 : vector<32x23xf32>, vector<32x23xf32>, vector<32x23xf32>, vector<32x23xf32> -> vector<128x23xf32>
    %c128_29 = arith.constant 128 : index
    %c0_30 = arith.constant 0 : index
    %88 = vector.load %arg1[%c128_29, %c0_30] : memref<144x128xf32, #tpu.memory_space<vmem>>, vector<16x128xf32>
    %cst_31 = arith.constant dense<0.000000e+00> : vector<16x23xf32>
    %89 = tpu.matmul %88, %87, %cst_31 {dimension_numbers = #tpu.dot_dimension_numbers<[1], [0], [0], [1], [0, 0, 1, 1], [], []>} : vector<16x128xf32>, vector<128x23xf32>, vector<16x23xf32> -> vector<16x23xf32>
    %c0_32 = arith.constant 0 : index
    %c36 = arith.constant 36 : index
    %90 = vector.load %arg1[%c0_32, %c36] : memref<144x128xf32, #tpu.memory_space<vmem>>, vector<16x1xf32>
    %c0_33 = arith.constant 0 : index
    %c37 = arith.constant 37 : index
    %91 = vector.load %arg1[%c0_33, %c37] : memref<144x128xf32, #tpu.memory_space<vmem>>, vector<16x1xf32>
    %c192 = arith.constant 192 : index
    %c0_34 = arith.constant 0 : index
    %92 = vector.load %arg2[%c192, %c0_34] : memref<216x64xf32, #tpu.memory_space<vmem>>, vector<23x1xf32>
    %c2 = arith.constant 2 : index
    %93 = memref.load %arg3[%c2] : memref<3xf32, #tpu.memory_space<smem>>
    %94 = arith.mulf %89, %89 : vector<16x23xf32>
    %95 = tpu.concatenate %89, %94 in 0 : vector<16x23xf32>, vector<16x23xf32> -> vector<32x23xf32>
    %cst_35 = arith.constant dense<0.000000e+00> : vector<32x1xf32>
    %96 = tpu.matmul %95, %92, %cst_35 {dimension_numbers = #tpu.dot_dimension_numbers<[1], [0], [0], [1], [0, 0, 1, 1], [], []>} : vector<32x23xf32>, vector<23x1xf32>, vector<32x1xf32> -> vector<32x1xf32>
    %97 = vector.extract_strided_slice %96 {offsets = [0, 0], sizes = [16, 1], strides = [1, 1]} : vector<32x1xf32> to vector<16x1xf32>
    %cst_36 = arith.constant 5.000000e-02 : f32
    %98 = vector.broadcast %cst_36 : f32 to vector<16x1xf32>
    %99 = arith.mulf %97, %98 : vector<16x1xf32>
    %100 = vector.extract_strided_slice %96 {offsets = [16, 0], sizes = [16, 1], strides = [1, 1]} : vector<32x1xf32> to vector<16x1xf32>
    %cst_37 = arith.constant 5.000000e-02 : f32
    %101 = vector.broadcast %cst_37 : f32 to vector<16x1xf32>
    %102 = arith.mulf %100, %101 : vector<16x1xf32>
    %103 = arith.mulf %99, %99 : vector<16x1xf32>
    %104 = arith.subf %102, %103 : vector<16x1xf32>
    %cst_38 = arith.constant 9.99999974E-6 : f32
    %105 = vector.broadcast %cst_38 : f32 to vector<16x1xf32>
    %106 = arith.addf %104, %105 : vector<16x1xf32>
    %107 = math.rsqrt %106 : vector<16x1xf32>
    %108 = arith.mulf %90, %107 : vector<16x1xf32>
    %109 = vector.broadcast %99 : vector<16x1xf32> to vector<16x23xf32>
    %110 = arith.subf %89, %109 : vector<16x23xf32>
    %111 = vector.broadcast %108 : vector<16x1xf32> to vector<16x23xf32>
    %112 = arith.mulf %110, %111 : vector<16x23xf32>
    %113 = vector.broadcast %91 : vector<16x1xf32> to vector<16x23xf32>
    %114 = arith.addf %112, %113 : vector<16x23xf32>
    %cst_39 = arith.constant 0.000000e+00 : f32
    %115 = vector.broadcast %cst_39 : f32 to vector<16x23xf32>
    %116 = arith.cmpf ogt, %114, %115 : vector<16x23xf32>
    %117 = vector.broadcast %93 : f32 to vector<16x23xf32>
    %118 = arith.mulf %117, %114 : vector<16x23xf32>
    %119 = arith.select %116, %114, %118 : vector<16x23xi1>, vector<16x23xf32>
    %120 = arith.mulf %119, %119 : vector<16x23xf32>
    %c192_40 = arith.constant 192 : index
    %c1_41 = arith.constant 1 : index
    %121 = vector.load %arg2[%c192_40, %c1_41] : memref<216x64xf32, #tpu.memory_space<vmem>>, vector<23x2xf32>
    %cst_42 = arith.constant dense<0.000000e+00> : vector<16x2xf32>
    %122 = tpu.matmul %120, %121, %cst_42 {dimension_numbers = #tpu.dot_dimension_numbers<[1], [0], [0], [1], [0, 0, 1, 1], [], []>} : vector<16x23xf32>, vector<23x2xf32>, vector<16x2xf32> -> vector<16x2xf32>
    %cst_43 = arith.constant dense<0.000000e+00> : vector<2xf32>
    %123 = vector.multi_reduction <add>, %122, %cst_43 [0] : vector<16x2xf32> to vector<2xf32>
    %124 = vector.shape_cast %123 : vector<2xf32> to vector<1x2xf32>
    %125 = math.rsqrt %124 : vector<1x2xf32>
    %c192_44 = arith.constant 192 : index
    %c23 = arith.constant 23 : index
    %126 = vector.load %arg2[%c192_44, %c23] : memref<216x64xf32, #tpu.memory_space<vmem>>, vector<2x20xf32>
    %cst_45 = arith.constant dense<0.000000e+00> : vector<1x20xf32>
    %127 = tpu.matmul %125, %126, %cst_45 {dimension_numbers = #tpu.dot_dimension_numbers<[1], [0], [0], [1], [0, 0, 1, 1], [], []>} : vector<1x2xf32>, vector<2x20xf32>, vector<1x20xf32> -> vector<1x20xf32>
    %c192_46 = arith.constant 192 : index
    %c3 = arith.constant 3 : index
    %128 = vector.load %arg2[%c192_46, %c3] : memref<216x64xf32, #tpu.memory_space<vmem>>, vector<23x20xf32>
    %cst_47 = arith.constant dense<0.000000e+00> : vector<16x20xf32>
    %129 = tpu.matmul %119, %128, %cst_47 {dimension_numbers = #tpu.dot_dimension_numbers<[1], [0], [0], [1], [0, 0, 1, 1], [], []>} : vector<16x23xf32>, vector<23x20xf32>, vector<16x20xf32> -> vector<16x20xf32>
    %130 = vector.broadcast %127 : vector<1x20xf32> to vector<16x20xf32>
    %131 = arith.mulf %129, %130 : vector<16x20xf32>
    %c0_48 = arith.constant 0 : index
    %c0_49 = arith.constant 0 : index
    %132 = vector.load %arg4[%c0_48, %c0_49] : memref<16x20xf32, #tpu.memory_space<vmem>>, vector<16x20xf32>
    tpu.vector_store %arg4[%c0_48, %c0_49], %131 {strides = array<i32>} : memref<16x20xf32, #tpu.memory_space<vmem>>, vector<16x20xf32>,
    return
  }
}

</mosaic_0001>

<bundles_post_ra>
// kernel: embedding_net_l2.1
= control target key start
LH: loop header
LB: loop body
LE: loop exit
PB: predicated region body
PF: predicated region fallthrough
CT: control target
= control target key end

     0   :  { %9 = vsyncpa [#allocation3], 0  ;;  %s3756_s0 = inlined_call_operand.vmem [shape: f32[8,128], index: 0, kind: input, shape index: {}]   ;;  %s3757_s1 = inlined_call_operand.vmem [shape: f32[144,128], index: 1, kind: input, shape index: {}]   ;;  %s3758_s2 = inlined_call_operand.vmem [shape: f32[216,64], index: 2, kind: input, shape index: {}]   ;;  %s3759_s3 = inlined_call_operand.vmem [shape: f32[3], index: 3, kind: input, shape index: {}]   ;;  %s3760_s4 = inlined_call_operand.vmem [shape: f32[16,20], index: 4, kind: output, shape index: {}]  }
   0x1   :  { %s22_s17 = sshll.u32 %s3759_s3, 4  ;;  %s23_s17 = int_to_ptr.vmem [resolvable:$true] %s22_s17 }
   0x2   :  { %s3107_s18 = scalar_lea.vmem %s23_s17, 16  ;;  %p3112_p1 = scmp.lt.s32.totalorder %s23_s17, %s23_s17 }
   0x3   :  { %p3108_p0 = scmp.ne.s32.totalorder %s23_s17, %s3107_s18  ;;  %p3113_p2 = scmp.lt.s32.totalorder %s3107_s18, %s3107_s18 }
   0x5   :  { %p3114_p3 = por %p3113_p2, %p3112_p1 }
   0x7   :  { %p3115_p4 = pnand %p3114_p3, %p3108_p0 }
   0x9   :  { %3118 = shalt.err (!%p3115_p4)
}
   0xa   :  { %s3121_s19 = smov [#allocation2]  }
   0xb   :  { %25 = dma.vmem_to_smem %s23_s17, 16, %s3121_s19, [#allocation3]  }
   0xc   :  { %3119 = dma.done.wait [#allocation3], 16  }
   0xd   :  { %3120 = vsyncadd [#allocation3], 4294967280 }
   0xe   :  { %29 = sfence }
   0xf   :  { %v30_v0 = vld [vmem:[%s3756_s0] sm:$0xff]  ;;  %vm49_vm0 = vcmask 261120   ;;  %s3122_s3 = smov 127   ;;  %s3123_s24 = smov 125   ;;  %v3190_v3 = vld [vmem:[%s3758_s2 + $0x8] sm:$0xff]  ;;  %v3195_v4 = vld [vmem:[%s3758_s2 + $0x10] sm:$0xff] }
  0x10   :  { %v3175_v1 = vld [vmem:[%s3757_s1] sm:$0xff]  ;;  %32 = vrot.lane.b32.xlu0 %v30_v0, %s3122_s3  ;;  %38 = vrot.lane.b32.xlu1 %v30_v0, %s3123_s24  ;;  %s3124_s25 = smov 126   ;;  %v3202_v6 = vld [vmem:[%s3758_s2 + $0x18] sm:$0xff]  ;;  %s3125_s15 = smov 68   ;;  %vm316_vm1 = vcmask 1044480   ;;  %vm3126_vm2 = vmmov 1  }
  0x11   :  { %2338 = vmatprep.mubr.msk.f32.mxu0 %vm49_vm0, %v3175_v1  ;;  %v3185_v2 = vld [vmem:[%s3758_s2] sm:$0xff]  ;;  %v3212_v8 = vld [vmem:[%s3758_s2 + $0x28] sm:$0xff]  ;;  %v2895_v9 = vpack.i.bf16 %v3202_v6, %v3195_v4  ;;  %v3219_v10 = vld [vmem:[%s3758_s2 + $0x30] sm:$0xff]  ;;  %vm267_vm4 = vcmask 1022976   ;;  %s3128_s21 = smov 32   ;;  %s195_s22 = sld [smem:[#allocation2]] }
  0x12   :  { %v2890_v5 = vpack.i.bf16 %v3190_v3, %v3185_v2  ;;  %v3207_v7 = vld [vmem:[%s3758_s2 + $0x20] sm:$0xff]  ;;  %v3224_v11 = vld [vmem:[%s3758_s2 + $0x38] sm:$0xff]  ;;  %v3238_v15 = vld [vmem:[%s3758_s2 + $0x48] sm:$0xff]  ;;  %s3131_s16 = smov 102   ;;  %vm1175_vm13 = vcmask 1040384   ;;  %vm1150_vm15 = vcmask 465920  }
  0x13   :  { %v2900_v12 = vpack.i.bf16 %v3212_v8, %v3207_v7  ;;  %v2905_v13 = vpack.i.bf16 %v3224_v11, %v3219_v10  ;;  %v3233_v14 = vld [vmem:[%s3758_s2 + $0x40] sm:$0xff]  ;;  %v3243_v16 = vld [vmem:[%s3758_s2 + $0x50] sm:$0xff]  ;;  %v3248_v17 = vld [vmem:[%s3758_s2 + $0x58] sm:$0xff]  ;;  %s3132_s6 = smov 34   ;;  %s3138_s28 = smov 105  }
  0x14   :  { %35 = vrot.lane.b32.xlu0 %v30_v0, %s3124_s25  ;;  %2891 = vrot.lane.b32.xlu1 %v2890_v5, %s3125_s15  ;;  %v193_v18 = vld [vmem:[%s3758_s2 + $0x70] sm:$0xff]  ;;  %v194_v19 = vld [vmem:[%s3758_s2 + $0x78] sm:$0x1f]  ;;  %v2910_v21 = vpack.i.bf16 %v3238_v15, %v3233_v14  ;;  %v2915_v22 = vpack.i.bf16 %v3248_v17, %v3243_v16  ;;  %vm3324_vm3 = vmpackc.low %vm316_vm1, %vm3126_vm2  ;;  %s2143_s29 = sld [smem:[#allocation2 + $0x2]] }
  0x15   :  { %v3256_v20 = vpack.c.bf16 %v194_v19, %v193_v18  ;;  %v3265_v23 = vld [vmem:[%s3758_s2 + $0x60] sm:$0xff]  ;;  %v3270_v24 = vld [vmem:[%s3758_s2 + $0x68] sm:$0xff]  ;;  %v2925_v26 = vpack.i.bf16 %v194_v19, %v193_v18  ;;  %v3282_v33 = vld [vmem:[%s3757_s1 + $0x10] sm:$0xff] }
  0x16   :  { %v2920_v25 = vpack.i.bf16 %v3270_v24, %v3265_v23  ;;  %v3277_v32 = vld [vmem:[%s3757_s1 + $0x8] sm:$0xff]  ;;  %v3291_v34 = vld [vmem:[%s3757_s1 + $0x18] sm:$0xff]  ;;  %v3296_v36 = vld [vmem:[%s3757_s1 + $0x20] sm:$0xff] }
  0x17   :  { %v3305_v43 = vld [vmem:[%s3757_s1 + $0x28] sm:$0xff]  ;;  %v3310_v46 = vld [vmem:[%s3757_s1 + $0x30] sm:$0xff]  ;;  %v3319_v53 = vld [vmem:[%s3757_s1 + $0x38] sm:$0xff] }
  0x18   :  { %2896 = vrot.lane.b32.xlu0 %v2895_v9, %s3125_s15  ;;  %2901 = vrot.lane.b32.xlu1 %v2900_v12, %s3125_s15  ;;  %vm3603_vm14 = vmpackc.low %vm1175_vm13, %vm3126_vm2 }
  0x1c   :  { %2906 = vrot.lane.b32.xlu0 %v2905_v13, %s3125_s15  ;;  %2911 = vrot.lane.b32.xlu1 %v2910_v21, %s3125_s15 }
  0x20   :  { %2916 = vrot.lane.b32.xlu0 %v2915_v22, %s3125_s15  ;;  %2921 = vrot.lane.b32.xlu1 %v2920_v25, %s3125_s15 }
  0x24   :  { %2926 = vrot.lane.b32.xlu0 %v2925_v26, %s3125_s15  ;;  %s2128_s15 = sld [smem:[#allocation2 + $0x1]] }
  0x82   :  { %v33_v27 = vpop.permute.xlu0 %32  ;;  %v39_v29 = vpop.permute.xlu1 %38 }
  0x83   :  { %v2646_v28 = vpack.c.bf16 %v33_v27, %v30_v0 }
  0x85   :  { %2647 = vmatprep.subr.bf16.mxu0 %v2646_v28 }
  0x86   :  { %2649 = vmatpush3.bf16.msra.mxu0 %v2646_v28  ;;  %v36_v30 = vpop.permute.xlu0 %35  ;;  %v2892_v35 = vpop.permute.xlu1 %2891 }
  0x87   :  { %v2650_v31 = vpack.c.bf16 %v39_v29, %v36_v30  ;;  %v2894_v38 = vunpack.i.h.bf16 %v2892_v35  ;;  %v2893_v39 = vunpack.i.l.bf16 %v2892_v35 }
  0x89   :  { %2651 = vmatprep.subr.bf16.mxu0 %v2650_v31  ;;  %v2654_v42 = vpack.c.bf16 %v2894_v38, %v2893_v39 }
  0x8a   :  { %2653 = vmatpush3.bf16.msra.mxu0 %v2650_v31  ;;  %v2897_v37 = vpop.permute.xlu0 %2896  ;;  %v2902_v45 = vpop.permute.xlu1 %2901 }
  0x8b   :  { %v2899_v40 = vunpack.i.h.bf16 %v2897_v37  ;;  %v2898_v41 = vunpack.i.l.bf16 %v2897_v37  ;;  %2655 = vmatprep.subr.bf16.mxu1 %v2654_v42  ;;  %v2904_v47 = vunpack.i.h.bf16 %v2902_v45  ;;  %v2903_v48 = vunpack.i.l.bf16 %v2902_v45 }
  0x8c   :  { %2657 = vmatpush3.bf16.msra.mxu1 %v2654_v42  ;;  %v3127_v45 = vmov 0  }
  0x8d   :  { %2339 = vmatmul.mubr.msk.f32.vlgmr.msra.gmra.mrb[0].mxu0 %vm49_vm0, %v3277_v32  ;;  %v2658_v44 = vpack.c.bf16 %v2899_v40, %v2898_v41  ;;  %v2662_v52 = vpack.c.bf16 %v2904_v47, %v2903_v48  ;;  %2931 = vset.pattern.permute.xlu0 %v3127_v45 }
  0x8e   :  { %2341 = vmatprep.mubr.msk.f32.mxu0 %vm49_vm0, %v3282_v33  ;;  %v2907_v49 = vpop.permute.xlu0 %2906  ;;  %v2912_v54 = vpop.permute.xlu1 %2911  ;;  %2930 = vset.pattern.permute.xlu1 %v3127_v45 }
  0x8f   :  { %2659 = vmatprep.subr.bf16.mxu1 %v2658_v44  ;;  %v2909_v50 = vunpack.i.h.bf16 %v2907_v49  ;;  %v2908_v51 = vunpack.i.l.bf16 %v2907_v49  ;;  %v2914_v56 = vunpack.i.h.bf16 %v2912_v54  ;;  %v2913_v57 = vunpack.i.l.bf16 %v2912_v54 }
  0x90   :  { %2661 = vmatpush3.bf16.msra.mxu1 %v2658_v44 }
  0x91   :  { %2342 = vmatmul.mubr.msk.f32.gmra.mrb[2].mxu0 %vm49_vm0, %v3291_v34  ;;  %v2666_v55 = vpack.c.bf16 %v2909_v50, %v2908_v51  ;;  %2663 = vmatprep.subr.bf16.mxu1 %v2662_v52  ;;  %v2670_v61 = vpack.c.bf16 %v2914_v56, %v2913_v57 }
  0x92   :  { %2344 = vmatprep.mubr.msk.f32.mxu0 %vm49_vm0, %v3296_v36  ;;  %v2917_v58 = vpop.permute.xlu0 %2916  ;;  %v2922_v62 = vpop.permute.xlu1 %2921 }
  0x93   :  { %v2919_v59 = vunpack.i.h.bf16 %v2917_v58  ;;  %v2918_v60 = vunpack.i.l.bf16 %v2917_v58  ;;  %v2924_v0 = vunpack.i.h.bf16 %v2922_v62  ;;  %v2923_v5 = vunpack.i.l.bf16 %v2922_v62 }
  0x94   :  { %2665 = vmatpush3.bf16.msra.mxu1 %v2662_v52 }
  0x95   :  { %2345 = vmatmul.mubr.msk.f32.gmra.mrb[4].mxu0 %vm49_vm0, %v3305_v43  ;;  %2667 = vmatprep.subr.bf16.mxu1 %v2666_v55  ;;  %v2674_v63 = vpack.c.bf16 %v2919_v59, %v2918_v60  ;;  %v2678_v12 = vpack.c.bf16 %v2924_v0, %v2923_v5 }
  0x96   :  { %2347 = vmatprep.mubr.msk.f32.mxu0 %vm49_vm0, %v3310_v46  ;;  %v2927_v9 = vpop.permute.xlu0 %2926 }
  0x97   :  { %v2929_v13 = vunpack.i.h.bf16 %v2927_v9  ;;  %v2928_v18 = vunpack.i.l.bf16 %v2927_v9 }
  0x98   :  { %2669 = vmatpush3.bf16.msra.mxu1 %v2666_v55 }
  0x99   :  { %2348 = vmatmul.mubr.msk.f32.gmra.mrb[6].mxu0 %vm49_vm0, %v3319_v53  ;;  %2671 = vmatprep.subr.bf16.mxu1 %v2670_v61  ;;  %v2682_v19 = vpack.c.bf16 %v2929_v13, %v2928_v18 }
  0x9c   :  { %2673 = vmatpush3.bf16.msra.mxu1 %v2670_v61 }
  0x9d   :  { %2675 = vmatprep.subr.bf16.mxu1 %v2674_v63 }
  0xa0   :  { %2677 = vmatpush3.bf16.msra.mxu1 %v2674_v63 }
  0xa1   :  { %2679 = vmatprep.subr.bf16.mxu1 %v2678_v12 }
  0xa4   :  { %2681 = vmatpush3.bf16.msra.mxu1 %v2678_v12 }
  0xa5   :  { %2684 = vmatprep.subr.msk.bf16.mxu1 %vm3324_vm3, %v2682_v19 }
  0xa8   :  { %2687 = vmatpush3.bf16.msk.msra.mxu1 %vm3324_vm3, %v2682_v19 }
 0x160   :  { %v3332_v22 = vpop.f32.mrb[0].mxu0 }
 0x161   :  { %v3334_v25 = vpop.f32.mrb[1].mxu0  ;;  %v197_v37 = vmul.f32 %v3332_v22, %v3332_v22 }
 0x162   :  { %2382 = vmatprep.mubr.msk.f32.mxu1 %vm267_vm4, %v3334_v25  ;;  %v196_v35 = vmul.f32 %v3334_v25, %v3334_v25 }
 0x163   :  { %2383 = vmatmul.mubr.msk.f32.vlgmr.msra.gmra.mrb[0].mxu1 %vm267_vm4, %v3332_v22 }
 0x164   :  { %v3340_v26 = vpop.f32.mrb[2].mxu0 }
 0x165   :  { %v3342_v27 = vpop.f32.mrb[3].mxu0  ;;  %v199_v39 = vmul.f32 %v3340_v26, %v3340_v26 }
 0x166   :  { %2385 = vmatprep.mubr.msk.f32.mxu1 %vm267_vm4, %v3342_v27  ;;  %v198_v38 = vmul.f32 %v3342_v27, %v3342_v27 }
 0x167   :  { %2386 = vmatmul.mubr.msk.f32.gmra.mrb[2].mxu1 %vm267_vm4, %v3340_v26 }
 0x168   :  { %v3348_v28 = vpop.f32.mrb[4].mxu0 }
 0x169   :  { %v3350_v29 = vpop.f32.mrb[5].mxu0  ;;  %v201_v41 = vmul.f32 %v3348_v28, %v3348_v28 }
 0x16a   :  { %2388 = vmatprep.mubr.msk.f32.mxu1 %vm267_vm4, %v3350_v29  ;;  %v200_v40 = vmul.f32 %v3350_v29, %v3350_v29 }
 0x16b   :  { %2389 = vmatmul.mubr.msk.f32.gmra.mrb[4].mxu1 %vm267_vm4, %v3348_v28 }
 0x16c   :  { %v3356_v30 = vpop.f32.mrb[6].mxu0 }
 0x16d   :  { %v3358_v31 = vpop.f32.mrb[7].mxu0  ;;  %v203_v44 = vmul.f32 %v3356_v30, %v3356_v30 }
 0x16e   :  { %2391 = vmatprep.mubr.msk.f32.mxu1 %vm267_vm4, %v3358_v31  ;;  %v202_v42 = vmul.f32 %v3358_v31, %v3358_v31 }
 0x16f   :  { %2392 = vmatmul.mubr.msk.f32.gmra.mrb[6].mxu1 %vm267_vm4, %v3356_v30 }
 0x170   :  { %2394 = vmatprep.mubr.msk.f32.mxu1 %vm267_vm4, %v196_v35 }
 0x173   :  { %2395 = vmatmul.mubr.msk.f32.gmra.mrb[8].mxu1 %vm267_vm4, %v197_v37 }
 0x174   :  { %2397 = vmatprep.mubr.msk.f32.mxu1 %vm267_vm4, %v198_v38 }
 0x177   :  { %2398 = vmatmul.mubr.msk.f32.gmra.mrb[10].mxu1 %vm267_vm4, %v199_v39 }
 0x178   :  { %2400 = vmatprep.mubr.msk.f32.mxu1 %vm267_vm4, %v200_v40 }
 0x17b   :  { %2401 = vmatmul.mubr.msk.f32.gmra.mrb[12].mxu1 %vm267_vm4, %v201_v41 }
 0x17c   :  { %2403 = vmatprep.mubr.msk.f32.mxu1 %vm267_vm4, %v202_v42 }
 0x17f   :  { %2404 = vmatmul.mubr.msk.f32.gmra.mrb[14].mxu1 %vm267_vm4, %v203_v44 }
 0x236   :  { %v2384_v47 = vpop.f32.mrb[0].mxu1 }
 0x237   :  { %v385_v48 = vpop.f32.mrb[1].mxu1  ;;  %v3390_v55 = vmul.f32 0.008196721, %v2384_v47 }
 0x238   :  { %v3392_v57 = vmul.f32 0.008196721, %v385_v48 }
 0x239   :  { %v481_v59 = vmul.f32 %v3390_v55, %v3390_v55 }
 0x23a   :  { %v2387_v49 = vpop.f32.mrb[2].mxu1  ;;  %v480_v63 = vmul.f32 %v3392_v57, %v3392_v57 }
 0x23b   :  { %v395_v50 = vpop.f32.mrb[3].mxu1  ;;  %v3396_v60 = vmul.f32 0.008196721, %v2387_v49 }
 0x23c   :  { %v3400_v0 = vmul.f32 0.008196721, %v395_v50 }
 0x23d   :  { %v483_v19 = vmul.f32 %v3396_v60, %v3396_v60 }
 0x23e   :  { %v2390_v51 = vpop.f32.mrb[4].mxu1  ;;  %v482_v39 = vmul.f32 %v3400_v0, %v3400_v0 }
 0x23f   :  { %v405_v52 = vpop.f32.mrb[5].mxu1  ;;  %v3402_v12 = vmul.f32 0.008196721, %v2390_v51 }
 0x240   :  { %v3408_v40 = vmul.f32 0.008196721, %v405_v52 }
 0x241   :  { %v485_v50 = vmul.f32 %v3402_v12, %v3402_v12 }
 0x242   :  { %v2393_v54 = vpop.f32.mrb[6].mxu1 }
 0x243   :  { %v415_v56 = vpop.f32.mrb[7].mxu1  ;;  %v3410_v47 = vmul.f32 0.008196721, %v2393_v54 }
 0x244   :  { %v470_v52 = vmul.f32 0.008196721, %v415_v56 }
 0x246   :  { %v2396_v58 = vpop.f32.mrb[8].mxu1 }
 0x247   :  { %v473_v61 = vmul.f32 0.008196721, %v2396_v58  ;;  %v425_v62 = vpop.f32.mrb[9].mxu1 }
 0x248   :  { %v472_v5 = vmul.f32 0.008196721, %v425_v62 }
 0x249   :  { %v489_v9 = vsub.f32 %v473_v61, %v481_v59  ;;  %v484_v61 = vmul.f32 %v3408_v40, %v3408_v40 }
 0x24a   :  { %v488_v13 = vsub.f32 %v472_v5, %v480_v63  ;;  %v2399_v18 = vpop.f32.mrb[10].mxu1 }
 0x24b   :  { %v497_v35 = vadd.f32 1e-05, %v489_v9  ;;  %v475_v37 = vmul.f32 0.008196721, %v2399_v18  ;;  %v435_v38 = vpop.f32.mrb[11].mxu1 }
 0x24c   :  { %v496_v41 = vadd.f32 1e-05, %v488_v13  ;;  %v474_v42 = vmul.f32 0.008196721, %v435_v38  ;;  %v487_v13 = vmul.f32 %v3410_v47, %v3410_v47 }
 0x24d   :  { %3077 = vrsqrt.f32 %v497_v35  ;;  %v491_v44 = vsub.f32 %v475_v37, %v483_v19  ;;  %v486_v37 = vmul.f32 %v470_v52, %v470_v52 }
 0x24e   :  { %3079 = vrsqrt.f32 %v496_v41  ;;  %v490_v48 = vsub.f32 %v474_v42, %v482_v39  ;;  %v2402_v49 = vpop.f32.mrb[12].mxu1 }
 0x24f   :  { %v499_v51 = vadd.f32 1e-05, %v491_v44  ;;  %v477_v58 = vmul.f32 0.008196721, %v2402_v49  ;;  %v445_v59 = vpop.f32.mrb[13].mxu1 }
 0x250   :  { %v498_v62 = vadd.f32 1e-05, %v490_v48  ;;  %v476_v63 = vmul.f32 0.008196721, %v445_v59 }
 0x251   :  { %3081 = vrsqrt.f32 %v499_v51  ;;  %v493_v5 = vsub.f32 %v477_v58, %v485_v50 }
 0x252   :  { %3083 = vrsqrt.f32 %v498_v62  ;;  %v492_v54 = vsub.f32 %v476_v63, %v484_v61  ;;  %v2405_v9 = vpop.f32.mrb[14].mxu1  ;;  %v3129_v63 = vmov 33  }
 0x253   :  { %v501_v18 = vadd.f32 1e-05, %v493_v5  ;;  %v479_v19 = vmul.f32 0.008196721, %v2405_v9  ;;  %v455_v35 = vpop.f32.mrb[15].mxu1 }
 0x254   :  { %v500_v38 = vadd.f32 1e-05, %v492_v54  ;;  %v478_v39 = vmul.f32 0.008196721, %v455_v35 }
 0x255   :  { %3085 = vrsqrt.f32 %v501_v18  ;;  %v495_v41 = vsub.f32 %v479_v19, %v487_v13 }
 0x256   :  { %3087 = vrsqrt.f32 %v500_v38  ;;  %v494_v56 = vsub.f32 %v478_v39, %v486_v37 }
 0x257   :  { %v3078_v42 = vpop.eup %3077  ;;  %v503_v44 = vadd.f32 1e-05, %v495_v41 }
 0x258   :  { %v3080_v48 = vpop.eup %3079  ;;  %v502_v49 = vadd.f32 1e-05, %v494_v56  ;;  %522 = vrot.lane.b32.xlu0 %v3078_v42, %s3128_s21 }
 0x259   :  { %3089 = vrsqrt.f32 %v503_v44  ;;  %520 = vrot.lane.b32.xlu1 %v3080_v48, %s3128_s21  ;;  %v696_v44 = vstv %s195_s22 }
 0x25a   :  { %3091 = vrsqrt.f32 %v502_v49 }
 0x25b   :  { %v3082_v50 = vpop.eup %3081 }
 0x25c   :  { %v3084_v51 = vpop.eup %3083  ;;  %526 = vrot.lane.b32.xlu0 %v3082_v50, %s3128_s21 }
 0x25d   :  { %524 = vrot.lane.b32.xlu1 %v3084_v51, %s3128_s21 }
 0x25f   :  { %v3086_v58 = vpop.eup %3085 }
 0x260   :  { %v3088_v59 = vpop.eup %3087  ;;  %530 = vrot.lane.b32.xlu0 %v3086_v58, %s3128_s21 }
 0x261   :  { %528 = vrot.lane.b32.xlu1 %v3088_v59, %s3128_s21 }
 0x263   :  { %v3090_v61 = vpop.eup %3089 }
 0x264   :  { %v3092_v62 = vpop.eup %3091  ;;  %534 = vrot.lane.b32.xlu0 %v3090_v61, %s3128_s21 }
 0x265   :  { %532 = vrot.lane.b32.xlu1 %v3092_v62, %s3128_s21 }
 0x268   :  { %559 = vperm.xlu0 %2931, %v3390_v55   ;;  %v3130_v55 = vmov 32  }
 0x269   :  { %554 = vperm.xlu1 %2930, %v3392_v57   ;;  %v2688_v57 = vpack.c.bf16 %v3190_v3, %v3185_v2  ;;  %v2704_v2 = vpack.c.bf16 %v3238_v15, %v3233_v14  ;;  %v2712_v14 = vpack.c.bf16 %v3270_v24, %v3265_v23 }
 0x26b   :  { %2689 = vmatprep.subr.bf16.mxu0 %v2688_v57 }
 0x26c   :  { %564 = vperm.xlu0 %2931, %v3400_v0   ;;  %2691 = vmatpush3.bf16.msra.mxu0 %v2688_v57  ;;  %v2696_v0 = vpack.c.bf16 %v3212_v8, %v3207_v7  ;;  %v2708_v7 = vpack.c.bf16 %v3248_v17, %v3243_v16 }
 0x26d   :  { %2932 = vset.pattern.permute.xlu1 %v3129_v63 }
 0x26e   :  { %649 = vperm.xlu1 %2932, %v3175_v1  }
 0x270   :  { %569 = vperm.xlu0 %2931, %v3396_v60   ;;  %v2692_v60 = vpack.c.bf16 %v3202_v6, %v3195_v4 }
 0x272   :  { %653 = vperm.xlu1 %2932, %v3277_v32   ;;  %2693 = vmatprep.subr.bf16.mxu0 %v2692_v60 }
 0x273   :  { %2695 = vmatpush3.bf16.msra.mxu0 %v2692_v60 }
 0x274   :  { %2934 = vset.pattern.permute.xlu0 %v3129_v63  ;;  %2697 = vmatprep.subr.bf16.mxu0 %v2696_v0 }
 0x275   :  { %657 = vperm.xlu0 %2934, %v3282_v33  }
 0x276   :  { %2933 = vset.pattern.permute.xlu1 %v3127_v45 }
 0x277   :  { %574 = vperm.xlu1 %2933, %v3408_v40   ;;  %2699 = vmatpush3.bf16.msra.mxu0 %v2696_v0 }
 0x279   :  { %665 = vperm.xlu0 %2934, %v3296_v36  }
 0x27b   :  { %579 = vperm.xlu1 %2933, %v3402_v12   ;;  %v2700_v12 = vpack.c.bf16 %v3224_v11, %v3219_v10 }
 0x27d   :  { %2939 = vset.pattern.permute.xlu0 %v3130_v55  ;;  %2701 = vmatprep.subr.bf16.mxu0 %v2700_v12 }
 0x27e   :  { %2703 = vmatpush3.bf16.msra.mxu0 %v2700_v12 }
 0x27f   :  { %2935 = vset.pattern.permute.xlu1 %v3129_v63  ;;  %2705 = vmatprep.subr.bf16.mxu0 %v2704_v2 }
 0x280   :  { %661 = vperm.xlu1 %2935, %v3291_v34  }
 0x282   :  { %2707 = vmatpush3.bf16.msra.mxu0 %v2704_v2 }
 0x283   :  { %2709 = vmatprep.subr.bf16.mxu0 %v2708_v7 }
 0x284   :  { %2936 = vset.pattern.permute.xlu1 %v3127_v45 }
 0x285   :  { %584 = vperm.xlu1 %2936, %v470_v52  }
 0x286   :  { %2711 = vmatpush3.bf16.msra.mxu0 %v2708_v7 }
 0x287   :  { %2713 = vmatprep.subr.bf16.mxu0 %v2712_v14 }
 0x289   :  { %589 = vperm.xlu1 %2936, %v3410_v47  }
 0x28a   :  { %2715 = vmatpush3.bf16.msra.mxu0 %v2712_v14 }
 0x28b   :  { %2718 = vmatprep.subr.msk.bf16.mxu0 %vm3324_vm3, %v3256_v20 }
 0x28d   :  { %2937 = vset.pattern.permute.xlu1 %v3129_v63 }
 0x28e   :  { %669 = vperm.xlu1 %2937, %v3305_v43   ;;  %2721 = vmatpush3.bf16.msk.msra.mxu0 %vm3324_vm3, %v3256_v20 }
 0x292   :  { %2938 = vset.pattern.permute.xlu1 %v3130_v55 }
 0x2ca   :  { %v523_v3 = vpop.permute.xlu0 %522 }
 0x2cb   :  { %v545_v4 = vmul.f32 %v523_v3, %v3277_v32  ;;  %v521_v6 = vpop.permute.xlu1 %520 }
 0x2cc   :  { %v544_v10 = vmul.f32 %v521_v6, %v3175_v1 }
 0x2cd   :  { %607 = vperm.xlu1 %2938, %v545_v4  }
 0x2ce   :  { %v527_v8 = vpop.permute.xlu0 %526 }
 0x2cf   :  { %v525_v11 = vpop.permute.xlu1 %524  ;;  %v547_v32 = vmul.f32 %v527_v8, %v3291_v34 }
 0x2d0   :  { %v546_v15 = vmul.f32 %v525_v11, %v3282_v33 }
 0x2d1   :  { %602 = vperm.xlu1 %2938, %v544_v10  }
 0x2d2   :  { %v531_v40 = vpop.permute.xlu0 %530  ;;  %612 = vperm.xlu0 %2939, %v546_v15  }
 0x2d3   :  { %v529_v16 = vpop.permute.xlu1 %528  ;;  %v549_v17 = vmul.f32 %v531_v40, %v3305_v43 }
 0x2d4   :  { %v548_v1 = vmul.f32 %v529_v16, %v3296_v36 }
 0x2d5   :  { %617 = vperm.xlu1 %2938, %v547_v32  }
 0x2d6   :  { %622 = vperm.xlu0 %2939, %v548_v1   ;;  %v535_v24 = vpop.permute.xlu0 %534 }
 0x2d7   :  { %v533_v23 = vpop.permute.xlu1 %532  ;;  %v551_v34 = vmul.f32 %v535_v24, %v3319_v53 }
 0x2d8   :  { %v550_v33 = vmul.f32 %v533_v23, %v3310_v46 }
 0x2d9   :  { %627 = vperm.xlu1 %2938, %v549_v17  }
 0x2da   :  { %632 = vperm.xlu0 %2939, %v550_v33  }
 0x2dd   :  { %637 = vperm.xlu1 %2938, %v551_v34  }
 0x2de   :  { %2941 = vset.pattern.permute.xlu0 %v3129_v63 }
 0x2df   :  { %677 = vperm.xlu0 %2941, %v3319_v53  }
 0x2e1   :  { %2940 = vset.pattern.permute.xlu1 %v3129_v63 }
 0x2e2   :  { %673 = vperm.xlu1 %2940, %v3310_v46  }
 0x2e3   :  { %3022 = vset.pattern.permute.xlu0 %v3127_v45 }
 0x2e6   :  { %3023 = vset.pattern.permute.xlu1 %v3127_v45 }
 0x2e7   :  { %v560_v52 = vpop.permute.xlu0 %559 }
 0x2e8   :  { %v555_v20 = vpop.permute.xlu1 %554  ;;  %v593_v46 = vsub.f32 %v3332_v22, %v560_v52 }
 0x2e9   :  { %v592_v39 = vsub.f32 %v3334_v25, %v555_v20 }
 0x2eb   :  { %v565_v54 = vpop.permute.xlu0 %564 }
 0x2ec   :  { %v594_v41 = vsub.f32 %v3342_v27, %v565_v54 }
 0x2ed   :  { %v650_v36 = vpop.permute.xlu1 %649 }
 0x2ef   :  { %v570_v13 = vpop.permute.xlu0 %569 }
 0x2f0   :  { %v595_v51 = vsub.f32 %v3340_v26, %v570_v13 }
 0x2f1   :  { %v654_v43 = vpop.permute.xlu1 %653 }
 0x2f4   :  { %v658_v18 = vpop.permute.xlu0 %657 }
 0x2f6   :  { %v575_v21 = vpop.permute.xlu1 %574 }
 0x2f7   :  { %v596_v59 = vsub.f32 %v3350_v29, %v575_v21 }
 0x2f8   :  { %v666_v35 = vpop.permute.xlu0 %665 }
 0x2fa   :  { %v580_v47 = vpop.permute.xlu1 %579 }
 0x2fb   :  { %v597_v60 = vsub.f32 %v3348_v28, %v580_v47 }
 0x2ff   :  { %v662_v5 = vpop.permute.xlu1 %661 }
 0x304   :  { %v3471_v9 = vpop.permute.xlu1 %584 }
 0x305   :  { %v598_v16 = vsub.f32 %v3358_v31, %v3471_v9 }
 0x308   :  { %v590_v53 = vpop.permute.xlu1 %589 }
 0x309   :  { %v599_v28 = vsub.f32 %v3356_v30, %v590_v53 }
 0x30d   :  { %v670_v19 = vpop.permute.xlu1 %669 }
 0x34c   :  { %v608_v37 = vpop.permute.xlu1 %607 }
 0x34d   :  { %v641_v38 = vmul.f32 %v608_v37, %v593_v46 }
 0x34f   :  { %v681_v56 = vadd.f32 %v654_v43, %v641_v38 }
 0x350   :  { %v603_v42 = vpop.permute.xlu1 %602 }
 0x351   :  { %v640_v48 = vmul.f32 %v603_v42, %v592_v39  ;;  %v613_v49 = vpop.permute.xlu0 %612  ;;  %v698_v61 = vmul.f32 %v696_v44, %v681_v56  ;;  %vm689_vm5 = vcmp.gt.f32.partialorder %v681_v56, 0.0 }
 0x352   :  { %v642_v50 = vmul.f32 %v613_v49, %v594_v41 }
 0x353   :  { %v680_v58 = vadd.f32 %v650_v36, %v640_v48  ;;  %v706_v2 = vsel %vm689_vm5, %v681_v56, %v698_v61  ;;  %vm1636_vm5 = vcmask 187392  }
 0x354   :  { %v682_v22 = vadd.f32 %v658_v18, %v642_v50  ;;  %v618_v62 = vpop.permute.xlu1 %617 }
 0x355   :  { %v697_v63 = vmul.f32 %v696_v44, %v680_v58  ;;  %v643_v55 = vmul.f32 %v618_v62, %v595_v51  ;;  %v623_v25 = vpop.permute.xlu0 %622  ;;  %vm688_vm6 = vcmp.gt.f32.partialorder %v680_v58, 0.0 }
 0x356   :  { %v699_v27 = vmul.f32 %v696_v44, %v682_v22  ;;  %v644_v57 = vmul.f32 %v623_v25, %v596_v59  ;;  %vm690_vm7 = vcmp.gt.f32.partialorder %v682_v22, 0.0  ;;  %v880_v25 = vld [vmem:[%s3757_s1 + $0x60] sm:$0xff] }
 0x357   :  { %v683_v0 = vadd.f32 %v662_v5, %v643_v55  ;;  %v705_v12 = vsel %vm688_vm6, %v680_v58, %v697_v63  ;;  %2482 = vmatprep.mubr.f32.mxu1 %v880_v25 }
 0x358   :  { %v684_v26 = vadd.f32 %v666_v35, %v644_v57  ;;  %2438 = vmatprep.mubr.msk.f32.mxu0 %vm267_vm4, %v705_v12  ;;  %v628_v29 = vpop.permute.xlu1 %627  ;;  %v707_v3 = vsel %vm690_vm7, %v682_v22, %v699_v27 }
 0x359   :  { %v700_v4 = vmul.f32 %v696_v44, %v683_v0  ;;  %v645_v6 = vmul.f32 %v628_v29, %v597_v60  ;;  %v633_v7 = vpop.permute.xlu0 %632  ;;  %2439 = vmatmul.mubr.msk.f32.vlgmr.msra.gmra.mrb[8].mxu0 %vm267_vm4, %v706_v2  ;;  %vm691_vm8 = vcmp.gt.f32.partialorder %v683_v0, 0.0 }
 0x35a   :  { %v701_v8 = vmul.f32 %v696_v44, %v684_v26  ;;  %2441 = vmatprep.mubr.msk.f32.mxu0 %vm267_vm4, %v707_v3  ;;  %vm692_vm9 = vcmp.gt.f32.partialorder %v684_v26, 0.0  ;;  %v646_v24 = vmul.f32 %v633_v7, %v598_v16 }
 0x35b   :  { %v685_v10 = vadd.f32 %v670_v19, %v645_v6  ;;  %v708_v11 = vsel %vm691_vm8, %v683_v0, %v700_v4  ;;  %vm1916_vm8 = vcmask 1041408  }
 0x35c   :  { %v638_v14 = vpop.permute.xlu1 %637  ;;  %v709_v15 = vsel %vm692_vm9, %v684_v26, %v701_v8  ;;  %vm3140_vm9 = vmmov 0  }
 0x35d   :  { %v702_v40 = vmul.f32 %v696_v44, %v685_v10  ;;  %v647_v32 = vmul.f32 %v638_v14, %v599_v28  ;;  %2442 = vmatmul.mubr.msk.f32.gmra.mrb[10].mxu0 %vm267_vm4, %v708_v11  ;;  %vm693_vm10 = vcmp.gt.f32.partialorder %v685_v10, 0.0 }
 0x35e   :  { %v678_v1 = vpop.permute.xlu0 %677  ;;  %2444 = vmatprep.mubr.msk.f32.mxu0 %vm267_vm4, %v709_v15  ;;  %v3524_v15 = vld [vmem:[%s3758_s2 + $0x80] sm:$0xff] }
 0x35f   :  { %v687_v17 = vadd.f32 %v678_v1, %v647_v32  ;;  %v710_v23 = vsel %vm693_vm10, %v685_v10, %v702_v40  ;;  %v3529_v40 = vld [vmem:[%s3758_s2 + $0x88] sm:$0xff]  ;;  %v3534_v32 = vld [vmem:[%s3758_s2 + $0x90] sm:$0xff]  ;;  %v3541_v1 = vld [vmem:[%s3758_s2 + $0x98] sm:$0xff]  ;;  %vm1898_vm10 = vcmask 15360  }
 0x360   :  { %v3002_v16 = vpack.i.bf16 %v3529_v40, %v3524_v15 }
 0x361   :  { %2445 = vmatmul.mubr.msk.f32.gmra.mrb[12].mxu0 %vm267_vm4, %v710_v23  ;;  %v674_v30 = vpop.permute.xlu1 %673  ;;  %v704_v34 = vmul.f32 %v696_v44, %v687_v17  ;;  %vm695_vm11 = vcmp.gt.f32.partialorder %v687_v17, 0.0  ;;  %v3551_v23 = vld [vmem:[%s3758_s2 + $0xa8] sm:$0xff] }
 0x362   :  { %v686_v33 = vadd.f32 %v674_v30, %v646_v24  ;;  %v3007_v24 = vpack.i.bf16 %v3541_v1, %v3534_v32  ;;  %v1112_v30 = vld [vmem:[%s3758_s2 + $0xb0] sm:$0xff] }
 0x363   :  { %v712_v43 = vsel %vm695_vm11, %v687_v17, %v704_v34  ;;  %v3546_v17 = vld [vmem:[%s3758_s2 + $0xa0] sm:$0xff]  ;;  %vm2086_vm11 = vcmask 162816  }
 0x364   :  { %vm694_vm12 = vcmp.gt.f32.partialorder %v686_v33, 0.0  ;;  %v703_v20 = vmul.f32 %v696_v44, %v686_v33  ;;  %v3012_v34 = vpack.i.bf16 %v3551_v23, %v3546_v17 }
 0x366   :  { %v711_v36 = vsel %vm694_vm12, %v686_v33, %v703_v20  ;;  %v1113_v33 = vld [vmem:[%s3758_s2 + $0xb8] sm:$0x1] }
 0x367   :  { %2447 = vmatprep.mubr.msk.f32.mxu0 %vm267_vm4, %v711_v36  ;;  %v3563_v20 = vpack.c.bf16 %v1113_v33, %v1112_v30  ;;  %v3017_v36 = vpack.i.bf16 %v1113_v33, %v1112_v30 }
 0x368   :  { %2448 = vmatmul.mubr.msk.f32.gmra.mrb[14].mxu0 %vm267_vm4, %v712_v43  ;;  %vm1649_vm4 = vcmask 1046528  }
 0x42c   :  { %v2440_v31 = vpop.f32.mrb[8].mxu0 }
 0x42d   :  { %v805_v21 = vpop.f32.mrb[9].mxu0 }
 0x42e   :  { %v2962_v47 = vpack.i.bf16 %v2440_v31, %v805_v21  ;;  %v3490_v52 = vpack.c.bf16 %v2440_v31, %v805_v21 }
 0x430   :  { %2943 = vrot.lane.b32.xlu1 %v2962_v47, %s3122_s3  ;;  %v2443_v5 = vpop.f32.mrb[10].mxu0 }
 0x431   :  { %v815_v54 = vpop.f32.mrb[11].mxu0 }
 0x432   :  { %v2967_v9 = vpack.i.bf16 %v2443_v5, %v815_v54  ;;  %v3493_v13 = vpack.c.bf16 %v2443_v5, %v815_v54 }
 0x434   :  { %2948 = vrot.lane.b32.xlu1 %v2967_v9, %s3122_s3  ;;  %v2446_v53 = vpop.f32.mrb[12].mxu0 }
 0x435   :  { %v825_v18 = vpop.f32.mrb[13].mxu0 }
 0x436   :  { %v2972_v19 = vpack.i.bf16 %v2446_v53, %v825_v18  ;;  %v3496_v46 = vpack.c.bf16 %v2446_v53, %v825_v18 }
 0x438   :  { %2953 = vrot.lane.b32.xlu0 %v2972_v19, %s3122_s3 }
 0x43b   :  { %v2449_v35 = vpop.f32.mrb[14].mxu0 }
 0x43c   :  { %2963 = vrot.lane.b32.xlu0 %v2962_v47, %s3124_s25  ;;  %v835_v37 = vpop.f32.mrb[15].mxu0 }
 0x43d   :  { %v2977_v38 = vpack.i.bf16 %v2449_v35, %v835_v37  ;;  %v3500_v39 = vpack.c.bf16 %v2449_v35, %v835_v37 }
 0x43f   :  { %2958 = vrot.lane.b32.xlu1 %v2977_v38, %s3122_s3 }
 0x440   :  { %2973 = vrot.lane.b32.xlu0 %v2972_v19, %s3124_s25 }
 0x443   :  { %2968 = vrot.lane.b32.xlu1 %v2967_v9, %s3124_s25 }
 0x447   :  { %2978 = vrot.lane.b32.xlu1 %v2977_v38, %s3124_s25 }
 0x4a2   :  { %v2944_v41 = vpop.permute.xlu1 %2943 }
 0x4a3   :  { %v2946_v56 = vunpack.i.h.bf16 %v2944_v41  ;;  %v2945_v42 = vunpack.i.l.bf16 %v2944_v41  ;;  %2983 = vrot.lane.b32.xlu0 %v2944_v41, %s3124_s25 }
 0x4a5   :  { %v3506_v44 = vpack.c.bf16 %v2946_v56, %v2945_v42 }
 0x4a6   :  { %v2949_v48 = vpop.permute.xlu1 %2948 }
 0x4a7   :  { %v2951_v49 = vunpack.i.h.bf16 %v2949_v48  ;;  %v2950_v50 = vunpack.i.l.bf16 %v2949_v48  ;;  %2988 = vrot.lane.b32.xlu1 %v2949_v48, %s3124_s25  ;;  %v881_v48 = vld [vmem:[%s3757_s1 + $0x68] sm:$0xff] }
 0x4a9   :  { %v3509_v51 = vpack.c.bf16 %v2951_v49, %v2950_v50  ;;  %v882_v49 = vld [vmem:[%s3757_s1 + $0x70] sm:$0xff]  ;;  %v883_v50 = vld [vmem:[%s3757_s1 + $0x78] sm:$0xff] }
 0x4aa   :  { %v2954_v58 = vpop.permute.xlu0 %2953 }
 0x4ab   :  { %v2956_v59 = vunpack.i.h.bf16 %v2954_v58  ;;  %v2955_v61 = vunpack.i.l.bf16 %v2954_v58  ;;  %2993 = vrot.lane.b32.xlu0 %v2954_v58, %s3124_s25  ;;  %v876_v58 = vld [vmem:[%s3757_s1 + $0x40] sm:$0xff] }
 0x4ad   :  { %v3512_v22 = vpack.c.bf16 %v2956_v59, %v2955_v61 }
 0x4ae   :  { %v2964_v62 = vpop.permute.xlu0 %2963 }
 0x4af   :  { %v2966_v63 = vunpack.i.h.bf16 %v2964_v62  ;;  %v2965_v55 = vunpack.i.l.bf16 %v2964_v62  ;;  %3003 = vrot.lane.b32.xlu0 %v3002_v16, %s3131_s16 }
 0x4b1   :  { %v2722_v27 = vpack.c.bf16 %v2966_v63, %v2965_v55  ;;  %v2959_v57 = vpop.permute.xlu1 %2958 }
 0x4b2   :  { %v2961_v60 = vunpack.i.h.bf16 %v2959_v57  ;;  %v2960_v0 = vunpack.i.l.bf16 %v2959_v57  ;;  %v2974_v12 = vpop.permute.xlu0 %2973  ;;  %2998 = vrot.lane.b32.xlu1 %v2959_v57, %s3124_s25 }
 0x4b3   :  { %2723 = vmatprep.subr.bf16.mxu1 %v2722_v27  ;;  %v2976_v29 = vunpack.i.h.bf16 %v2974_v12  ;;  %v2975_v3 = vunpack.i.l.bf16 %v2974_v12  ;;  %3013 = vrot.lane.b32.xlu0 %v3012_v34, %s3131_s16  ;;  %v879_v12 = vld [vmem:[%s3757_s1 + $0x58] sm:$0xff] }
 0x4b4   :  { %v3518_v2 = vpack.c.bf16 %v2961_v60, %v2960_v0  ;;  %2725 = vmatpush3.bf16.msra.mxu1 %v2722_v27 }
 0x4b5   :  { %v2969_v26 = vpop.permute.xlu1 %2968  ;;  %v2730_v28 = vpack.c.bf16 %v2976_v29, %v2975_v3 }
 0x4b6   :  { %v2971_v4 = vunpack.i.h.bf16 %v2969_v26  ;;  %v2970_v6 = vunpack.i.l.bf16 %v2969_v26  ;;  %3008 = vrot.lane.b32.xlu1 %v3007_v24, %s3131_s16 }
 0x4b8   :  { %v2726_v7 = vpack.c.bf16 %v2971_v4, %v2970_v6 }
 0x4b9   :  { %v2979_v8 = vpop.permute.xlu1 %2978 }
 0x4ba   :  { %v2981_v10 = vunpack.i.h.bf16 %v2979_v8  ;;  %v2980_v11 = vunpack.i.l.bf16 %v2979_v8  ;;  %2727 = vmatprep.subr.bf16.mxu1 %v2726_v7  ;;  %3018 = vrot.lane.b32.xlu1 %v3017_v36, %s3131_s16 }
 0x4bb   :  { %2729 = vmatpush3.bf16.msra.mxu1 %v2726_v7 }
 0x4bc   :  { %2731 = vmatprep.subr.bf16.mxu1 %v2730_v28  ;;  %v2734_v14 = vpack.c.bf16 %v2981_v10, %v2980_v11 }
 0x4bf   :  { %2733 = vmatpush3.bf16.msra.mxu1 %v2730_v28 }
 0x4c0   :  { %2735 = vmatprep.subr.bf16.mxu1 %v2734_v14 }
 0x4c3   :  { %2737 = vmatpush3.bf16.msra.mxu1 %v2734_v14 }
 0x515   :  { %v2984_v43 = vpop.permute.xlu0 %2983 }
 0x516   :  { %v2986_v31 = vunpack.i.h.bf16 %v2984_v43  ;;  %v2985_v21 = vunpack.i.l.bf16 %v2984_v43 }
 0x518   :  { %v2738_v47 = vpack.c.bf16 %v2986_v31, %v2985_v21 }
 0x519   :  { %v2989_v5 = vpop.permute.xlu1 %2988 }
 0x51a   :  { %v2991_v54 = vunpack.i.h.bf16 %v2989_v5  ;;  %v2990_v9 = vunpack.i.l.bf16 %v2989_v5  ;;  %2739 = vmatprep.subr.bf16.mxu1 %v2738_v47 }
 0x51b   :  { %2741 = vmatpush3.bf16.msra.mxu1 %v2738_v47 }
 0x51c   :  { %v2742_v53 = vpack.c.bf16 %v2991_v54, %v2990_v9 }
 0x51d   :  { %v2994_v18 = vpop.permute.xlu0 %2993 }
 0x51e   :  { %v2996_v19 = vunpack.i.h.bf16 %v2994_v18  ;;  %v2995_v35 = vunpack.i.l.bf16 %v2994_v18  ;;  %2743 = vmatprep.subr.bf16.mxu1 %v2742_v53 }
 0x51f   :  { %2745 = vmatpush3.bf16.msra.mxu1 %v2742_v53 }
 0x520   :  { %v2746_v37 = vpack.c.bf16 %v2996_v19, %v2995_v35 }
 0x522   :  { %2747 = vmatprep.subr.bf16.mxu1 %v2746_v37 }
 0x523   :  { %2749 = vmatpush3.bf16.msra.mxu1 %v2746_v37 }
 0x524   :  { %v2999_v38 = vpop.permute.xlu1 %2998 }
 0x525   :  { %v3001_v41 = vunpack.i.h.bf16 %v2999_v38  ;;  %v3000_v56 = vunpack.i.l.bf16 %v2999_v38 }
 0x527   :  { %v2750_v42 = vpack.c.bf16 %v3001_v41, %v3000_v56 }
 0x528   :  { %v3009_v59 = vpop.permute.xlu1 %3008 }
 0x529   :  { %2751 = vmatprep.subr.bf16.mxu1 %v2750_v42  ;;  %v3011_v61 = vunpack.i.h.bf16 %v3009_v59 }
 0x52a   :  { %2753 = vmatpush3.bf16.msra.mxu1 %v2750_v42 }
 0x52b   :  { %2755 = vmatprep.subr.bf16.mxu1 %v3490_v52 }
 0x52c   :  { %v3019_v27 = vpop.permute.xlu1 %3018 }
 0x52d   :  { %2483 = vmatmul.mubr.f32.vlgmr.msra.gmra.mrb[16].mxu1 %v881_v48  ;;  %v3021_v60 = vunpack.i.h.bf16 %v3019_v27  ;;  %v3020_v0 = vunpack.i.l.bf16 %v3019_v27 }
 0x52e   :  { %2757 = vmatpush3.bf16.msra.mxu1 %v3490_v52  ;;  %2485 = vmatprep.mubr.f32.mxu1 %v882_v49  ;;  %v3004_v52 = vpop.permute.xlu0 %3003 }
 0x52f   :  { %2759 = vmatprep.subr.bf16.mxu1 %v3493_v13 }
 0x531   :  { %2486 = vmatmul.mubr.f32.gmra.mrb[18].mxu1 %v883_v50 }
 0x532   :  { %2761 = vmatpush3.bf16.msra.mxu1 %v3493_v13  ;;  %2520 = vmatprep.mubr.f32.mxu1 %v876_v58  ;;  %v3006_v13 = vunpack.i.h.bf16 %v3004_v52  ;;  %v3014_v63 = vpop.permute.xlu0 %3013 }
 0x533   :  { %2763 = vmatprep.subr.bf16.mxu1 %v3496_v46  ;;  %v3016_v55 = vunpack.i.h.bf16 %v3014_v63  ;;  %v3015_v25 = vunpack.i.l.bf16 %v3014_v63  ;;  %v2808_v63 = vpack.c.bf16 %v3541_v1, %v3534_v32 }
 0x535   :  { %v2794_v57 = vpack.c.bf16 %v3016_v55, %v3015_v25 }
 0x536   :  { %2765 = vmatpush3.bf16.msra.mxu1 %v3496_v46  ;;  %v3005_v46 = vunpack.i.l.bf16 %v3004_v52 }
 0x537   :  { %2767 = vmatprep.subr.bf16.mxu1 %v3500_v39 }
 0x538   :  { %v2786_v62 = vpack.c.bf16 %v3006_v13, %v3005_v46 }
 0x53a   :  { %2769 = vmatpush3.bf16.msra.mxu1 %v3500_v39  ;;  %v3010_v39 = vunpack.i.l.bf16 %v3009_v59  ;;  %2787 = vmatprep.subr.bf16.mxu0 %v2786_v62 }
 0x53b   :  { %2771 = vmatprep.subr.bf16.mxu1 %v3506_v44  ;;  %2789 = vmatpush3.bf16.msra.mxu0 %v2786_v62  ;;  %v3134_v62 = vmov 34  }
 0x53e   :  { %2773 = vmatpush3.bf16.msra.mxu1 %v3506_v44  ;;  %v877_v44 = vld [vmem:[%s3757_s1 + $0x48] sm:$0xff] }
 0x53f   :  { %2775 = vmatprep.subr.bf16.mxu1 %v3509_v51 }
 0x542   :  { %2777 = vmatpush3.bf16.msra.mxu1 %v3509_v51  ;;  %v2790_v51 = vpack.c.bf16 %v3011_v61, %v3010_v39  ;;  %v3642_v61 = vld [vmem:[%s3757_s1] sm:$0xff]  ;;  %v3133_v39 = vmov 35  }
 0x543   :  { %2779 = vmatprep.subr.bf16.mxu1 %v3512_v22 }
 0x544   :  { %2791 = vmatprep.subr.bf16.mxu0 %v2790_v51 }
 0x545   :  { %2793 = vmatpush3.bf16.msra.mxu0 %v2790_v51  ;;  %v2804_v51 = vpack.c.bf16 %v3529_v40, %v3524_v15  ;;  %v1105_v15 = vld [vmem:[%s3757_s1 + $0x18] sm:$0xff]  ;;  %v2812_v40 = vpack.c.bf16 %v3551_v23, %v3546_v17 }
 0x546   :  { %2781 = vmatpush3.bf16.msra.mxu1 %v3512_v22  ;;  %v878_v22 = vld [vmem:[%s3757_s1 + $0x50] sm:$0xff]  ;;  %2795 = vmatprep.subr.bf16.mxu0 %v2794_v57 }
 0x547   :  { %2783 = vmatprep.subr.bf16.mxu1 %v3518_v2 }
 0x549   :  { %2797 = vmatpush3.bf16.msra.mxu0 %v2794_v57  ;;  %v1104_v57 = vld [vmem:[%s3757_s1 + $0x10] sm:$0xff] }
 0x54a   :  { %2785 = vmatpush3.bf16.msra.mxu1 %v3518_v2  ;;  %v2798_v2 = vpack.c.bf16 %v3021_v60, %v3020_v0 }
 0x54c   :  { %2800 = vmatprep.subr.msk.bf16.mxu0 %vm3603_vm14, %v2798_v2 }
 0x54d   :  { %2521 = vmatmul.mubr.f32.vlgmr.msra.gmra.mrb[16].mxu1 %v877_v44  ;;  %2803 = vmatpush3.bf16.msk.msra.mxu0 %vm3603_vm14, %v2798_v2  ;;  %v3648_v44 = vld [vmem:[%s3757_s1 + $0x8] sm:$0xff] }
 0x54e   :  { %2523 = vmatprep.mubr.f32.mxu1 %v878_v22  ;;  %2805 = vmatprep.subr.bf16.mxu0 %v2804_v51 }
 0x551   :  { %2524 = vmatmul.mubr.f32.gmra.mrb[18].mxu1 %v879_v12 }
 0x620   :  { %v3611_v29 = vpop.f32.mrb[16].mxu1 }
 0x621   :  { %v3613_v3 = vpop.f32.mrb[17].mxu1  ;;  %v1116_v8 = vmul.f32 %v3611_v29, %v3611_v29 }
 0x622   :  { %2542 = vmatprep.mubr.msk.f32.mxu0 %vm1150_vm15, %v3613_v3  ;;  %v1115_v7 = vmul.f32 %v3613_v3, %v3613_v3 }
 0x623   :  { %2543 = vmatmul.mubr.msk.f32.vlgmr.msra.gmra.mrb[16].mxu0 %vm1150_vm15, %v3611_v29 }
 0x624   :  { %v3619_v4 = vpop.f32.mrb[18].mxu1  ;;  %2807 = vmatpush3.bf16.msra.mxu0 %v2804_v51 }
 0x625   :  { %v3621_v6 = vpop.f32.mrb[19].mxu1  ;;  %v1118_v10 = vmul.f32 %v3619_v4, %v3619_v4  ;;  %2809 = vmatprep.subr.bf16.mxu0 %v2808_v63 }
 0x626   :  { %2545 = vmatprep.mubr.msk.f32.mxu0 %vm1150_vm15, %v3621_v6  ;;  %v1117_v28 = vmul.f32 %v3621_v6, %v3621_v6 }
 0x627   :  { %2546 = vmatmul.mubr.msk.f32.gmra.mrb[18].mxu0 %vm1150_vm15, %v3619_v4 }
 0x628   :  { %2548 = vmatprep.mubr.msk.f32.mxu0 %vm1150_vm15, %v1115_v7  ;;  %2811 = vmatpush3.bf16.msra.mxu0 %v2808_v63 }
 0x629   :  { %2813 = vmatprep.subr.bf16.mxu0 %v2812_v40 }
 0x62b   :  { %2549 = vmatmul.mubr.msk.f32.gmra.mrb[20].mxu0 %vm1150_vm15, %v1116_v8 }
 0x62c   :  { %2551 = vmatprep.mubr.msk.f32.mxu0 %vm1150_vm15, %v1117_v28  ;;  %2815 = vmatpush3.bf16.msra.mxu0 %v2812_v40 }
 0x62d   :  { %2818 = vmatprep.subr.msk.bf16.mxu0 %vm3603_vm14, %v3563_v20 }
 0x62f   :  { %2552 = vmatmul.mubr.msk.f32.gmra.mrb[22].mxu0 %vm1150_vm15, %v1118_v10 }
 0x630   :  { %2821 = vmatpush3.bf16.msk.msra.mxu0 %vm3603_vm14, %v3563_v20 }
 0x6f6   :  { %v2544_v11 = vpop.f32.mrb[16].mxu0 }
 0x6f7   :  { %v1244_v14 = vpop.f32.mrb[17].mxu0  ;;  %v1284_v24 = vmul.f32 0.018518519, %v2544_v11 }
 0x6f8   :  { %v1283_v33 = vmul.f32 0.018518519, %v1244_v14  ;;  %v1403_v14 = vstv %s2128_s15 }
 0x6f9   :  { %v1292_v36 = vmul.f32 %v1284_v24, %v1284_v24 }
 0x6fa   :  { %v2547_v16 = vpop.f32.mrb[18].mxu0  ;;  %v1291_v47 = vmul.f32 %v1283_v33, %v1283_v33 }
 0x6fb   :  { %v1254_v30 = vpop.f32.mrb[19].mxu0  ;;  %v1286_v43 = vmul.f32 0.018518519, %v2547_v16 }
 0x6fc   :  { %v1285_v5 = vmul.f32 0.018518519, %v1254_v30 }
 0x6fd   :  { %v1294_v19 = vmul.f32 %v1286_v43, %v1286_v43 }
 0x6fe   :  { %v2550_v34 = vpop.f32.mrb[20].mxu0  ;;  %v1293_v41 = vmul.f32 %v1285_v5, %v1285_v5 }
 0x6ff   :  { %v1288_v31 = vmul.f32 0.018518519, %v2550_v34  ;;  %v1264_v21 = vpop.f32.mrb[21].mxu0 }
 0x700   :  { %v1287_v54 = vmul.f32 0.018518519, %v1264_v21 }
 0x701   :  { %v1296_v9 = vsub.f32 %v1288_v31, %v1292_v36 }
 0x702   :  { %v1295_v53 = vsub.f32 %v1287_v54, %v1291_v47  ;;  %v2553_v18 = vpop.f32.mrb[22].mxu0 }
 0x703   :  { %v1300_v35 = vadd.f32 1e-05, %v1296_v9  ;;  %v1290_v37 = vmul.f32 0.018518519, %v2553_v18  ;;  %v1274_v38 = vpop.f32.mrb[23].mxu0 }
 0x704   :  { %v1299_v56 = vadd.f32 1e-05, %v1295_v53  ;;  %v1289_v42 = vmul.f32 0.018518519, %v1274_v38 }
 0x705   :  { %3093 = vrsqrt.f32 %v1300_v35  ;;  %v1298_v48 = vsub.f32 %v1290_v37, %v1294_v19 }
 0x706   :  { %3095 = vrsqrt.f32 %v1299_v56  ;;  %v1297_v49 = vsub.f32 %v1289_v42, %v1293_v41 }
 0x707   :  { %v1302_v50 = vadd.f32 1e-05, %v1298_v48 }
 0x708   :  { %v1301_v58 = vadd.f32 1e-05, %v1297_v49 }
 0x709   :  { %3097 = vrsqrt.f32 %v1302_v50  ;;  %v1551_v50 = vld [vmem:[%s3757_s1 + $0x80] sm:$0xff] }
 0x70a   :  { %3099 = vrsqrt.f32 %v1301_v58  ;;  %v3693_v58 = vld [vmem:[%s3758_s2 + $0xc0] sm:$0xff] }
 0x70f   :  { %v3094_v52 = vpop.eup %3093 }
 0x710   :  { %v3096_v13 = vpop.eup %3095  ;;  %1313 = vrot.lane.b32.xlu1 %v3094_v52, %s3132_s6  ;;  %v3698_v52 = vld [vmem:[%s3758_s2 + $0xc8] sm:$0xff] }
 0x711   :  { %1311 = vrot.lane.b32.xlu0 %v3096_v13, %s3132_s6  ;;  %v2854_v13 = vpack.c.bf16 %v3698_v52, %v3693_v58 }
 0x713   :  { %v3098_v46 = vpop.eup %3097  ;;  %2855 = vmatprep.subr.bf16.mxu1 %v2854_v13 }
 0x714   :  { %v3100_v59 = vpop.eup %3099  ;;  %1317 = vrot.lane.b32.xlu1 %v3098_v46, %s3132_s6  ;;  %v3705_v46 = vld [vmem:[%s3758_s2 + $0xd0] sm:$0x7f]  ;;  %2857 = vmatpush3.bf16.msra.mxu1 %v2854_v13 }
 0x715   :  { %1315 = vrot.lane.b32.xlu0 %v3100_v59, %s3132_s6  ;;  %2615 = vmatprep.subr.msk.mxu1 %vm1649_vm4, %v3705_v46 }
 0x718   :  { %1334 = vperm.xlu1 %3023, %v1284_v24   ;;  %2616 = vmatpush3.msk.msra.mxu1 %vm1649_vm4, %v3705_v46 }
 0x719   :  { %1329 = vperm.xlu0 %3022, %v1283_v33  }
 0x71c   :  { %1339 = vperm.xlu1 %3023, %v1285_v5  }
 0x71d   :  { %1344 = vperm.xlu0 %3022, %v1286_v43  }
 0x720   :  { %3024 = vset.pattern.permute.xlu1 %v3133_v39 }
 0x721   :  { %1377 = vperm.xlu1 %3024, %v3642_v61   ;;  %3025 = vset.pattern.permute.xlu0 %v3134_v62 }
 0x725   :  { %1382 = vperm.xlu1 %3024, %v3648_v44  }
 0x729   :  { %3026 = vset.pattern.permute.xlu1 %v3134_v62 }
 0x782   :  { %v1314_v22 = vpop.permute.xlu1 %1313 }
 0x783   :  { %v1324_v55 = vmul.f32 %v1314_v22, %v3648_v44  ;;  %v1312_v25 = vpop.permute.xlu0 %1311 }
 0x784   :  { %v1323_v27 = vmul.f32 %v1312_v25, %v3642_v61 }
 0x785   :  { %1358 = vperm.xlu0 %3025, %v1324_v55  }
 0x786   :  { %1353 = vperm.xlu1 %3026, %v1323_v27   ;;  %v1318_v32 = vpop.permute.xlu1 %1317 }
 0x787   :  { %v1326_v1 = vmul.f32 %v1318_v32, %v1105_v15  ;;  %v1316_v60 = vpop.permute.xlu0 %1315 }
 0x788   :  { %v1325_v17 = vmul.f32 %v1316_v60, %v1104_v57 }
 0x789   :  { %1368 = vperm.xlu0 %3025, %v1326_v1  }
 0x78a   :  { %3027 = vset.pattern.permute.xlu1 %v3133_v39 }
 0x78b   :  { %1387 = vperm.xlu1 %3027, %v1104_v57  }
 0x78d   :  { %3060 = vset.pattern.permute.xlu0 %v3127_v45 }
 0x78f   :  { %3028 = vset.pattern.permute.xlu1 %v3134_v62 }
 0x790   :  { %1363 = vperm.xlu1 %3028, %v1325_v17  }
 0x794   :  { %3029 = vset.pattern.permute.xlu1 %v3133_v39 }
 0x795   :  { %1392 = vperm.xlu1 %3029, %v1105_v15  }
 0x797   :  { %v1335_v23 = vpop.permute.xlu1 %1334 }
 0x798   :  { %v1330_v12 = vpop.permute.xlu0 %1329  ;;  %v1348_v28 = vsub.f32 %v3611_v29, %v1335_v23 }
 0x799   :  { %3061 = vset.pattern.permute.xlu1 %v3127_v45  ;;  %v1347_v20 = vsub.f32 %v3613_v3, %v1330_v12 }
 0x79b   :  { %v1340_v0 = vpop.permute.xlu1 %1339 }
 0x79c   :  { %v1345_v7 = vpop.permute.xlu0 %1344  ;;  %v1349_v29 = vsub.f32 %v3621_v6, %v1340_v0 }
 0x79d   :  { %v1350_v47 = vsub.f32 %v3619_v4, %v1345_v7 }
 0x7a0   :  { %v1378_v2 = vpop.permute.xlu1 %1377 }
 0x7a4   :  { %v1383_v8 = vpop.permute.xlu1 %1382 }
 0x804   :  { %v1359_v26 = vpop.permute.xlu0 %1358 }
 0x805   :  { %v1372_v10 = vmul.f32 %v1359_v26, %v1348_v28  ;;  %v1354_v11 = vpop.permute.xlu1 %1353  ;;  %v1552_v26 = vld [vmem:[%s3757_s1 + $0x88] sm:$0xff]  ;;  %s3135_s1 = smov 36  }
 0x806   :  { %v1371_v16 = vmul.f32 %v1354_v11, %v1347_v20 }
 0x807   :  { %v1396_v24 = vadd.f32 %v1383_v8, %v1372_v10 }
 0x808   :  { %v1395_v30 = vadd.f32 %v1378_v2, %v1371_v16  ;;  %v1369_v31 = vpop.permute.xlu0 %1368 }
 0x809   :  { %v1405_v33 = vmul.f32 %v1403_v14, %v1396_v24  ;;  %vm1400_vm0 = vcmp.gt.f32.partialorder %v1396_v24, 0.0  ;;  %v1374_v54 = vmul.f32 %v1369_v31, %v1350_v47 }
 0x80a   :  { %v1404_v45 = vmul.f32 %v1403_v14, %v1395_v30  ;;  %v1388_v34 = vpop.permute.xlu1 %1387  ;;  %vm1399_vm1 = vcmp.gt.f32.partialorder %v1395_v30, 0.0 }
 0x80b   :  { %v1409_v43 = vsel %vm1400_vm0, %v1396_v24, %v1405_v33 }
 0x80c   :  { %v1408_v36 = vsel %vm1399_vm1, %v1395_v30, %v1404_v45 }
 0x80d   :  { %2570 = vmatprep.mubr.msk.f32.mxu0 %vm1150_vm15, %v1408_v36 }
 0x80e   :  { %2571 = vmatmul.mubr.msk.f32.vlgmr.msra.gmra.mrb[24].mxu0 %vm1150_vm15, %v1409_v43 }
 0x80f   :  { %v1364_v3 = vpop.permute.xlu1 %1363 }
 0x810   :  { %v1373_v21 = vmul.f32 %v1364_v3, %v1349_v29 }
 0x812   :  { %v1397_v5 = vadd.f32 %v1388_v34, %v1373_v21 }
 0x814   :  { %v1406_v9 = vmul.f32 %v1403_v14, %v1397_v5  ;;  %v1393_v53 = vpop.permute.xlu1 %1392  ;;  %vm1401_vm2 = vcmp.gt.f32.partialorder %v1397_v5, 0.0 }
 0x815   :  { %v1398_v18 = vadd.f32 %v1393_v53, %v1374_v54 }
 0x816   :  { %v1410_v19 = vsel %vm1401_vm2, %v1397_v5, %v1406_v9 }
 0x817   :  { %vm1402_vm3 = vcmp.gt.f32.partialorder %v1398_v18, 0.0  ;;  %v1407_v35 = vmul.f32 %v1403_v14, %v1398_v18  ;;  %2573 = vmatprep.mubr.msk.f32.mxu0 %vm1150_vm15, %v1410_v19  ;;  %v3137_v19 = vmov 36  }
 0x819   :  { %v1411_v37 = vsel %vm1402_vm3, %v1398_v18, %v1407_v35  ;;  %v3136_v18 = vmov 37  }
 0x81a   :  { %2574 = vmatmul.mubr.msk.f32.gmra.mrb[26].mxu0 %vm1150_vm15, %v1411_v37 }
 0x81b   :  { %2608 = vmatprep.mubr.f32.mxu0 %v1551_v50 }
 0x8e1   :  { %v2572_v6 = vpop.f32.mrb[24].mxu0 }
 0x8e2   :  { %v1492_v38 = vpop.f32.mrb[25].mxu0 }
 0x8e3   :  { %v3030_v41 = vpack.i.bf16 %v2572_v6, %v1492_v38  ;;  %v2822_v56 = vpack.c.bf16 %v2572_v6, %v1492_v38 }
 0x8e5   :  { %3031 = vrot.lane.b32.xlu0 %v3030_v41, %s3122_s3  ;;  %2823 = vmatprep.subr.bf16.mxu0 %v2822_v56 }
 0x8e6   :  { %2825 = vmatpush3.bf16.msra.mxu0 %v2822_v56 }
 0x8e9   :  { %3041 = vrot.lane.b32.xlu0 %v3030_v41, %s3124_s25 }
 0x8ed   :  { %3051 = vrot.lane.b32.xlu0 %v3030_v41, %s3123_s24  ;;  %v2575_v4 = vpop.f32.mrb[26].mxu0  ;;  %v3066_v41 = vpack.i.bf16 %v3698_v52, %v3693_v58  ;;  %v1798_v52 = vstv %s2143_s29 }
 0x8ee   :  { %v1502_v42 = vpop.f32.mrb[27].mxu0 }
 0x8ef   :  { %v3035_v48 = vpack.i.bf16 %v2575_v4, %v1502_v42  ;;  %v2826_v49 = vpack.c.bf16 %v2575_v4, %v1502_v42 }
 0x8f1   :  { %3036 = vrot.lane.b32.xlu1 %v3035_v48, %s3122_s3  ;;  %2827 = vmatprep.subr.bf16.mxu0 %v2826_v49 }
 0x8f2   :  { %2829 = vmatpush3.bf16.msra.mxu0 %v2826_v49 }
 0x8f5   :  { %3046 = vrot.lane.b32.xlu1 %v3035_v48, %s3124_s25 }
 0x8f9   :  { %3056 = vrot.lane.b32.xlu1 %v3035_v48, %s3123_s24 }
 0x957   :  { %v3032_v59 = vpop.permute.xlu0 %3031 }
 0x958   :  { %v3034_v39 = vunpack.i.h.bf16 %v3032_v59  ;;  %v3033_v62 = vunpack.i.l.bf16 %v3032_v59 }
 0x95a   :  { %v2830_v51 = vpack.c.bf16 %v3034_v39, %v3033_v62 }
 0x95b   :  { %v3042_v63 = vpop.permute.xlu0 %3041 }
 0x95c   :  { %2831 = vmatprep.subr.bf16.mxu0 %v2830_v51  ;;  %v3044_v55 = vunpack.i.h.bf16 %v3042_v63  ;;  %v3043_v25 = vunpack.i.l.bf16 %v3042_v63 }
 0x95d   :  { %2833 = vmatpush3.bf16.msra.mxu0 %v2830_v51 }
 0x95e   :  { %v2838_v1 = vpack.c.bf16 %v3044_v55, %v3043_v25 }
 0x95f   :  { %v3052_v17 = vpop.permute.xlu0 %3051 }
 0x960   :  { %v3054_v23 = vunpack.i.h.bf16 %v3052_v17  ;;  %v3053_v0 = vunpack.i.l.bf16 %v3052_v17 }
 0x962   :  { %v2846_v7 = vpack.c.bf16 %v3054_v23, %v3053_v0 }
 0x963   :  { %v3037_v22 = vpop.permute.xlu1 %3036 }
 0x964   :  { %v3039_v27 = vunpack.i.h.bf16 %v3037_v22  ;;  %v3038_v15 = vunpack.i.l.bf16 %v3037_v22 }
 0x966   :  { %v2834_v40 = vpack.c.bf16 %v3039_v27, %v3038_v15 }
 0x967   :  { %v3047_v32 = vpop.permute.xlu1 %3046 }
 0x968   :  { %v3049_v57 = vunpack.i.h.bf16 %v3047_v32  ;;  %v3048_v60 = vunpack.i.l.bf16 %v3047_v32  ;;  %2835 = vmatprep.subr.bf16.mxu0 %v2834_v40 }
 0x969   :  { %2837 = vmatpush3.bf16.msra.mxu0 %v2834_v40 }
 0x96a   :  { %2839 = vmatprep.subr.bf16.mxu0 %v2838_v1  ;;  %v2842_v12 = vpack.c.bf16 %v3049_v57, %v3048_v60 }
 0x96b   :  { %v3057_v2 = vpop.permute.xlu1 %3056 }
 0x96c   :  { %v3059_v8 = vunpack.i.h.bf16 %v3057_v2  ;;  %v3058_v28 = vunpack.i.l.bf16 %v3057_v2  ;;  %v3139_v2 = vmov 0.0  }
 0x96d   :  { %2841 = vmatpush3.bf16.msra.mxu0 %v2838_v1  ;;  %2632 = vmatprep.subr.mxu1 %v3139_v2 }
 0x96e   :  { %2843 = vmatprep.subr.bf16.mxu0 %v2842_v12  ;;  %v2850_v20 = vpack.c.bf16 %v3059_v8, %v3058_v28 }
 0x971   :  { %2845 = vmatpush3.bf16.msra.mxu0 %v2842_v12 }
 0x972   :  { %2847 = vmatprep.subr.bf16.mxu0 %v2846_v7 }
 0x975   :  { %2849 = vmatpush3.bf16.msra.mxu0 %v2846_v7 }
 0x976   :  { %2851 = vmatprep.subr.bf16.mxu0 %v2850_v20 }
 0x979   :  { %2853 = vmatpush3.bf16.msra.mxu0 %v2850_v20 }
 0x97c   :  { %2609 = vmatmul.mubr.f32.vlgmr.msra.gmra.mrb[28].mxu0 %v1552_v26 }
 0xa4f   :  { %v3714_v10 = vpop.f32.mrb[28].mxu0 }
 0xa50   :  { %v1619_v11 = vpop.f32.mrb[29].mxu0  ;;  %v1635_v16 = vmul.f32 %v3714_v10, %v3714_v10 }
 0xa51   :  { %v1634_v14 = vmul.f32 %v1619_v11, %v1619_v11  ;;  %2617 = vmatprep.mubr.msk.f32.mxu1 %vm1636_vm5, %v1619_v11 }
 0xa52   :  { %2618 = vmatmul.mubr.msk.f32.vlgmr.msra.gmra.mrb[20].mxu1 %vm1636_vm5, %v3714_v10 }
 0xa53   :  { %2620 = vmatprep.mubr.msk.f32.mxu1 %vm1636_vm5, %v1634_v14 }
 0xa56   :  { %2621 = vmatmul.mubr.msk.f32.gmra.mrb[22].mxu1 %vm1636_vm5, %v1635_v16 }
 0xa57   :  { %2634 = vmatprep.mubr.msk.f32.mxu1 %vm3140_vm9, %v3139_v2 }
 0xb25   :  { %v2619_v24 = vpop.f32.mrb[20].mxu1 }
 0xb26   :  { %v1739_v30 = vmul.f32 0.05, %v2619_v24  ;;  %v1719_v33 = vpop.f32.mrb[21].mxu1 }
 0xb27   :  { %v1738_v45 = vmul.f32 0.05, %v1719_v33 }
 0xb28   :  { %v1743_v36 = vmul.f32 %v1739_v30, %v1739_v30 }
 0xb29   :  { %v2622_v34 = vpop.f32.mrb[22].mxu1  ;;  %v1742_v3 = vmul.f32 %v1738_v45, %v1738_v45 }
 0xb2a   :  { %v1741_v43 = vmul.f32 0.05, %v2622_v34  ;;  %v1729_v29 = vpop.f32.mrb[23].mxu1 }
 0xb2b   :  { %v1740_v31 = vmul.f32 0.05, %v1729_v29 }
 0xb2c   :  { %v1745_v21 = vsub.f32 %v1741_v43, %v1743_v36  ;;  %v2080_v36 = vlaneseq }
 0xb2d   :  { %v1744_v47 = vsub.f32 %v1740_v31, %v1742_v3 }
 0xb2e   :  { %v1747_v5 = vadd.f32 1e-05, %v1745_v21  ;;  %v2081_v43 = vshrl.u32 %v2080_v36, 7 }
 0xb2f   :  { %v1746_v54 = vadd.f32 1e-05, %v1744_v47 }
 0xb30   :  { %3101 = vrsqrt.f32 %v1747_v5  ;;  %v2082_v29 = vsub.s32 0, %v2081_v43 }
 0xb31   :  { %3103 = vrsqrt.f32 %v1746_v54 }
 0xb3a   :  { %v3102_v9 = vpop.eup %3101 }
 0xb3b   :  { %v3104_v53 = vpop.eup %3103  ;;  %1754 = vrot.lane.b32.xlu1 %v3102_v9, %s3135_s1 }
 0xb3c   :  { %1752 = vrot.lane.b32.xlu0 %v3104_v53, %s3135_s1 }
 0xb3f   :  { %1767 = vperm.xlu1 %3061, %v1739_v30  }
 0xb40   :  { %1762 = vperm.xlu0 %3060, %v1738_v45  }
 0xb43   :  { %3062 = vset.pattern.permute.xlu1 %v3136_v18 }
 0xb44   :  { %1786 = vperm.xlu1 %3062, %v3642_v61   ;;  %3063 = vset.pattern.permute.xlu0 %v3137_v19 }
 0xb48   :  { %3064 = vset.pattern.permute.xlu1 %v3137_v19 }
 0xbad   :  { %v1755_v35 = vpop.permute.xlu1 %1754 }
 0xbae   :  { %v1759_v37 = vmul.f32 %v1755_v35, %v3648_v44  ;;  %v1753_v6 = vpop.permute.xlu0 %1752 }
 0xbaf   :  { %v1758_v38 = vmul.f32 %v1753_v6, %v3642_v61  ;;  %v1909_v61 = vld [vmem:[%s3758_s2 + $0xc0] sm:$0x3] }
 0xbb0   :  { %1779 = vperm.xlu0 %3063, %v1759_v37  }
 0xbb1   :  { %1774 = vperm.xlu1 %3064, %v1758_v38  }
 0xbb4   :  { %3067 = vrot.lane.b32.xlu0 %v3066_v41, %s3122_s3 }
 0xbb5   :  { %3065 = vset.pattern.permute.xlu1 %v3136_v18  ;;  %3076 = vset.pattern.permute.xlu0 %v3136_v18 }
 0xbb6   :  { %1791 = vperm.xlu1 %3065, %v3648_v44  }
 0xbb8   :  { %3072 = vrot.lane.b32.xlu0 %v3066_v41, %s3123_s24 }
 0xbba   :  { %1811 = vrot.lane.b32.xlu1 %v3705_v46, %s3122_s3 }
 0xbbc   :  { %1993 = vrot.lane.b32.xlu0 %v3705_v46, %s3123_s24 }
 0xbbe   :  { %1911 = vrot.lane.b32.xlu1 %v1909_v61, %s3138_s28  ;;  %v1768_v56 = vpop.permute.xlu1 %1767 }
 0xbbf   :  { %v1763_v42 = vpop.permute.xlu0 %1762  ;;  %v1771_v58 = vsub.f32 %v3714_v10, %v1768_v56 }
 0xbc0   :  { %v1770_v48 = vsub.f32 %v1619_v11, %v1763_v42 }
 0xbc3   :  { %v1787_v4 = vpop.permute.xlu1 %1786 }
 0xc2f   :  { %v1780_v44 = vpop.permute.xlu0 %1779 }
 0xc30   :  { %v1775_v49 = vpop.permute.xlu1 %1774  ;;  %v1783_v46 = vmul.f32 %v1780_v44, %v1771_v58 }
 0xc31   :  { %v1782_v50 = vmul.f32 %v1775_v49, %v1770_v48 }
 0xc33   :  { %v1794_v13 = vadd.f32 %v1787_v4, %v1782_v50  ;;  %v3068_v59 = vpop.permute.xlu0 %3067 }
 0xc34   :  { %v3070_v39 = vunpack.i.h.bf16 %v3068_v59  ;;  %v3069_v62 = vunpack.i.l.bf16 %v3068_v59 }
 0xc35   :  { %vm1796_vm6 = vcmp.gt.f32.partialorder %v1794_v13, 0.0  ;;  %v1792_v51 = vpop.permute.xlu1 %1791  ;;  %v1799_v63 = vmul.f32 %v1798_v52, %v1794_v13 }
 0xc36   :  { %v2858_v22 = vpack.c.bf16 %v3070_v39, %v3069_v62  ;;  %v1795_v55 = vadd.f32 %v1792_v51, %v1783_v46 }
 0xc37   :  { %v3073_v25 = vpop.permute.xlu0 %3072  ;;  %v1801_v27 = vsel %vm1796_vm6, %v1794_v13, %v1799_v63 }
 0xc38   :  { %vm1797_vm7 = vcmp.gt.f32.partialorder %v1795_v55, 0.0  ;;  %v1800_v15 = vmul.f32 %v1798_v52, %v1795_v55  ;;  %2859 = vmatprep.subr.bf16.mxu0 %v2858_v22  ;;  %v3075_v40 = vunpack.i.h.bf16 %v3073_v25  ;;  %v3074_v32 = vunpack.i.l.bf16 %v3073_v25 }
 0xc39   :  { %2861 = vmatpush3.bf16.msra.mxu0 %v2858_v22  ;;  %v1803_v1 = vmul.f32 %v1801_v27, %v1801_v27  ;;  %v1812_v57 = vpop.permute.xlu1 %1811 }
 0xc3a   :  { %v1802_v60 = vsel %vm1797_vm7, %v1795_v55, %v1800_v15  ;;  %v2862_v17 = vpack.c.bf16 %v3075_v40, %v3074_v32  ;;  %2627 = vmatprep.subr.msk.mxu0 %vm1649_vm4, %v1812_v57 }
 0xc3b   :  { %v1804_v23 = vmul.f32 %v1802_v60, %v1802_v60  ;;  %2629 = vmatprep.mubr.msk.f32.mxu0 %vm1636_vm5, %v1803_v1  ;;  %v1994_v0 = vpop.permute.xlu0 %1993 }
 0xc3d   :  { %2628 = vmatpush3.msk.msra.mxu0 %vm1649_vm4, %v1812_v57  ;;  %v1912_v12 = vpop.permute.xlu1 %1911 }
 0xc3e   :  { %2630 = vmatmul.mubr.msk.f32.vlgmr.msra.gmra.mrb[30].mxu0 %vm1636_vm5, %v1804_v23  ;;  %2863 = vmatprep.subr.bf16.mxu0 %v2862_v17 }
 0xc3f   :  { %2865 = vmatpush3.bf16.msra.mxu0 %v2862_v17  ;;  %2643 = vmatprep.mubr.msk.f32.mxu0 %vm1636_vm5, %v1801_v27 }
 0xc40   :  { %2641 = vmatprep.subr.msk.mxu0 %vm1649_vm4, %v1994_v0  ;;  %2633 = vmatpush3.msk.msra.mxu1 %vm1916_vm8, %v1912_v12 }
 0xc43   :  { %2642 = vmatpush3.msk.msra.mxu0 %vm1649_vm4, %v1994_v0 }
 0xc44   :  { %2644 = vmatmul.mubr.msk.f32.vlgmr.msra.gmra.mrb[32].mxu0 %vm1636_vm5, %v1802_v60 }
 0xd11   :  { %v2631_v7 = vpop.f32.mrb[30].mxu0 }
 0xd12   :  { %v1900_v8 = vsel %vm1898_vm10, %v2631_v7, 0.0  ;;  %v1889_v28 = vpop.f32.mrb[31].mxu0 }
 0xd13   :  { %v1899_v20 = vsel %vm1898_vm10, %v1889_v28, 0.0 }
 0xd14   :  { %v1901_v26 = vadd.f32 %v1900_v8, %v1899_v20 }
 0xd16   :  { %v1902_v10 = vrot.slane %v1901_v26, 4 }
 0xd17   :  { %v2645_v11 = vpop.f32.mrb[32].mxu0 }
 0xd18   :  { %v1903_v14 = vadd.f32 %v1902_v10, %v1901_v26  ;;  %v2071_v16 = vpop.f32.mrb[33].mxu0 }
 0xd1a   :  { %v1904_v24 = vrot.slane %v1903_v14, 2 }
 0xd1c   :  { %v1905_v30 = vadd.f32 %v1904_v24, %v1903_v14 }
 0xd1e   :  { %v1906_v33 = vrot.slane %v1905_v30, 1 }
 0xd20   :  { %v1907_v45 = vadd.f32 %v1906_v33, %v1905_v30 }
 0xd22   :  { %3105 = vrsqrt.f32 %v1907_v45 }
 0xd2c   :  { %v3106_v34 = vpop.eup %3105 }
 0xd2d   :  { %2635 = vmatmul.mubr.msk.f32.vlgmr.msra.gmra.mrb[24].mxu1 %vm1898_vm10, %v3106_v34 }
 0xe00   :  { %v1985_v3 = vpop.f32.mrb[24].mxu1 }
 0xe01   :  { %v2083_v31 = vrot.slane %v1985_v3, %v2082_v29  ;;  %v2636_v21 = vpop.f32.mrb[25].mxu1 }
 0xe03   :  { %v2084_v47 = vmul.f32 %v2083_v31, %v2071_v16  ;;  %v2085_v5 = vmul.f32 %v2645_v11, %v2083_v31 }
 0xe05   :  { %2087 = vst.msk [vmem:[%s3760_s4] sm:$0xff] %vm2086_vm11, %v2084_v47  ;;  %2088 = vst.msk [vmem:[%s3760_s4 + $0x8] sm:$0xff] %vm2086_vm11, %v2085_v5 }
 0xe06   :  { %2093 = vsyncpa [#allocation3], 1 }

</bundles_post_ra>
